<compile_context>
chip_gen: v7x
topology: tpu7x:2x2x1
jax: 0.10.0
libtpu: 0.0.40
codegen_flags: <defaults>
</compile_context>

<pallas_src>
import functools

import jax
import jax.numpy as jnp
from jax import lax
from jax.experimental import pallas as pl
from jax.experimental.pallas import tpu as pltpu


def _tokenizer_kernel(x_ref, w_ref, b_ref, cbT_ref, c2_ref, cb_ref, emb_ref,
                      idx_ref, cv_ref, *, num_codebooks, d_model):
    """One tile of TM token rows: encoder matmul -> RVQ stages -> embedding.

    x_ref   : (TM, D_in)  f32        input rows
    w_ref   : (D_in, D_lat) f32      encoder weight
    b_ref   : (1, D_lat) f32         encoder bias
    cbT_ref : (Q, D_lat, K)          pre-transposed RVQ codebooks (f32 or bf16,
                                     distance-matmul operand only)
    c2_ref  : (Q, 1, K) f32          precomputed ||c||^2 per stage
    cb_ref  : (Q, K, D_lat) f32      codebooks (gather RHS for residual update)
    emb_ref : (K, d_model) f32       shared embedding table (gather RHS for cv)
    idx_ref : (TM, Q) int32          selected code indices
    cv_ref  : (TM, Q * d_model)      flattened code vectors (f32 or bf16)
    """
    tm = x_ref.shape[0]
    k = cbT_ref.shape[2]
    dist_dtype = cbT_ref.dtype  # distance-matmul operand dtype

    # --- Encoder: linear projection on the MXU, f32 accumulation -----------
    latent = jnp.dot(x_ref[...], w_ref[...],
                     preferred_element_type=jnp.float32) + b_ref[...]

    residual = latent                                   # (TM, D_lat) f32
    idx_cols = []
    lane_iota = lax.broadcasted_iota(jnp.int32, (tm, k), 1)

    # --- Residual vector quantization (static small loop over stages) ------
    for q in range(num_codebooks):
        # argmin ||r - c||^2 == argmin(||c||^2 - 2 r.c): ||r||^2 is row-constant.
        dots = jnp.dot(residual.astype(dist_dtype), cbT_ref[q],
                       preferred_element_type=jnp.float32)           # (TM, K)
        dist = c2_ref[q] - 2.0 * dots                                 # (TM, K)
        idx = jnp.argmin(dist, axis=-1, keepdims=True).astype(jnp.int32)  # (TM,1)
        idx_cols.append(idx)

        # Gather-as-matmul (exact f32 one-hot selection of table rows).
        onehot = (lane_iota == idx).astype(jnp.float32)               # (TM, K)

        # Code vector from the shared embedding table; store directly into the
        # lane-dense output slab (static, 128-aligned slice -> unmasked vst).
        cv = jnp.dot(onehot, emb_ref[...],
                     preferred_element_type=jnp.float32)              # (TM, d_model)
        cv_ref[:, q * d_model:(q + 1) * d_model] = cv.astype(cv_ref.dtype)

        # Residual update (not needed after the last stage).
        if q + 1 < num_codebooks:
            qv = jnp.dot(onehot, cb_ref[q],
                         preferred_element_type=jnp.float32)          # (TM, D_lat)
            residual = residual - qv

    # --- Batched index store (tiny: Q lanes) --------------------------------
    idx_ref[...] = jnp.concatenate(idx_cols, axis=-1)                 # (TM, Q)


def tokenizer_forward(x, enc_w, enc_b, codebooks, emb_table, *,
                      row_tile=512, use_bf16_distance=True,
                      cv_dtype=jnp.float32):
    """x: (B, T, D_in) f32 -> (code_index (B,T,Q) i32, code_vector (B,T,Q,d_model))."""
    B, T, D_in = x.shape
    num_codebooks, K, D_lat = codebooks.shape
    d_model = emb_table.shape[1]
    N = B * T

    # Pick the row tile: big by default (amortizes per-grid-step overhead), but
    # shrink for small N so there are >= 2 grid steps (v7x: 2 TensorCores share
    # work only along the parallel grid axis).
    rt = int(row_tile)
    if N <= rt:
        half = -(-N // 2)                      # ceil(N/2)
        rt = max(8, ((half + 7) // 8) * 8)     # multiple of 8 sublanes
    n_tiles = int(pl.cdiv(N, rt))
    N_pad = n_tiles * rt

    x_flat = x.reshape(N, D_in).astype(jnp.float32)
    if N_pad != N:
        # Pad token rows up to the tile; padded rows are trimmed after the call.
        x_flat = jnp.pad(x_flat, ((0, N_pad - N), (0, 0)))

    # Grid-invariant tables, precomputed once outside the kernel.
    codebooks_f32 = codebooks.astype(jnp.float32)
    cbT = jnp.transpose(codebooks_f32, (0, 2, 1))                  # (Q, D_lat, K)
    if use_bf16_distance:
        cbT = cbT.astype(jnp.bfloat16)   # distance matmul only; gathers stay f32
    c2 = jnp.sum(codebooks_f32 * codebooks_f32, axis=-1)[:, None, :]  # (Q, 1, K)
    emb_f32 = emb_table.astype(jnp.float32)                        # (K, d_model)
    enc_w_f32 = enc_w.astype(jnp.float32)
    enc_b2 = enc_b.reshape(1, D_lat).astype(jnp.float32)

    kernel = functools.partial(_tokenizer_kernel,
                               num_codebooks=num_codebooks, d_model=d_model)

    flops = int(
        2 * N_pad * D_in * D_lat                                  # encoder
        + num_codebooks * 2 * N_pad * D_lat * K                   # distances
        + num_codebooks * 2 * N_pad * K * d_model                 # emb gathers
        + (num_codebooks - 1) * 2 * N_pad * K * D_lat)            # residual gathers
    cv_itemsize = jnp.dtype(cv_dtype).itemsize
    bytes_accessed = int(
        x_flat.size * 4
        + enc_w_f32.size * 4 + enc_b2.size * 4
        + cbT.size * cbT.dtype.itemsize + c2.size * 4
        + codebooks_f32.size * 4 + emb_f32.size * 4
        + N_pad * num_codebooks * 4                                # idx out
        + N_pad * num_codebooks * d_model * cv_itemsize)           # cv out

    idx_out, cv_out = pl.pallas_call(
        kernel,
        out_shape=(
            jax.ShapeDtypeStruct((N_pad, num_codebooks), jnp.int32),
            jax.ShapeDtypeStruct((N_pad, num_codebooks * d_model), cv_dtype),
        ),
        grid_spec=pl.GridSpec(
            grid=(n_tiles,),
            in_specs=[
                pl.BlockSpec((rt, D_in), lambda i: (i, 0)),                  # x tile
                pl.BlockSpec((D_in, D_lat), lambda i: (0, 0)),               # enc W
                pl.BlockSpec((1, D_lat), lambda i: (0, 0)),                  # enc b
                pl.BlockSpec((num_codebooks, D_lat, K), lambda i: (0, 0, 0)),  # cb^T (dist)
                pl.BlockSpec((num_codebooks, 1, K), lambda i: (0, 0, 0)),    # ||c||^2
                pl.BlockSpec((num_codebooks, K, D_lat), lambda i: (0, 0, 0)),  # cb (gather)
                pl.BlockSpec((K, d_model), lambda i: (0, 0)),                # shared emb
            ],
            out_specs=(
                pl.BlockSpec((rt, num_codebooks), lambda i: (i, 0)),
                pl.BlockSpec((rt, num_codebooks * d_model), lambda i: (i, 0)),
            ),
        ),
        compiler_params=pltpu.CompilerParams(
            dimension_semantics=("parallel",),          # shards tiles across TCs on v7x
            vmem_limit_bytes=32 * 1024 * 1024),         # fits v5e/v6e/v7x scoped VMEM
        cost_estimate=pl.CostEstimate(
            flops=flops, transcendentals=0, bytes_accessed=bytes_accessed),
    )(x_flat, enc_w_f32, enc_b2, cbT, c2, codebooks_f32, emb_f32)

    code_index = idx_out[:N].reshape(B, T, num_codebooks)
    code_vector = cv_out[:N].reshape(B, T, num_codebooks, d_model)
    return code_index, code_vector


def _reference_forward(x, enc_w, enc_b, codebooks, emb_table):
    """Pure-JAX reference of the same semantics (for verification)."""
    B, T, D_in = x.shape
    num_codebooks, K, D_lat = codebooks.shape
    latent = x.reshape(-1, D_in) @ enc_w + enc_b[None, :]
    residual = latent
    idxs = []
    for q in range(num_codebooks):
        cb = codebooks[q]
        dist = (jnp.sum(residual ** 2, axis=-1, keepdims=True)
                - 2.0 * residual @ cb.T
                + jnp.sum(cb ** 2, axis=-1)[None, :])
        idx = jnp.argmin(dist, axis=-1)
        idxs.append(idx)
        residual = residual - cb[idx]
    code_index = jnp.stack(idxs, axis=-1).reshape(B, T, num_codebooks)
    code_vector = emb_table[code_index]
    return code_index.astype(jnp.int32), code_vector


if __name__ == "__main__":
    # Small shapes consistent with the module defaults (synthetic init).
    B, T = 2, 8
    D_in = 64           # encoder input feature size
    latent_dim = 256
    d_model = 256
    codebook_size = 256
    num_codebooks = 3

    key = jax.random.PRNGKey(0)
    k_x, k_w, k_b, k_cb, k_emb = jax.random.split(key, 5)

    x = jax.random.normal(k_x, (B, T, D_in), dtype=jnp.float32)
    enc_w = jax.random.normal(k_w, (D_in, latent_dim), dtype=jnp.float32) * 0.1
    enc_b = jax.random.normal(k_b, (latent_dim,), dtype=jnp.float32) * 0.1
    codebooks = jax.random.normal(
        k_cb, (num_codebooks, codebook_size, latent_dim), dtype=jnp.float32)
    emb_table = jax.random.normal(
        k_emb, (codebook_size, d_model), dtype=jnp.float32)

    ref_idx, ref_cv = _reference_forward(x, enc_w, enc_b, codebooks, emb_table)

    # --- Exact-precision run (f32 distance matmul): matches the reference ---
    code_index, code_vector = tokenizer_forward(
        x, enc_w, enc_b, codebooks, emb_table, use_bf16_distance=False)
    jax.block_until_ready(code_vector)
    assert code_index.shape == (B, T, num_codebooks)
    assert code_vector.shape == (B, T, num_codebooks, d_model)
    assert jnp.array_equal(code_index, ref_idx)
    assert jnp.allclose(code_vector, ref_cv, atol=1e-4, rtol=1e-4)

    # --- Default perf path (bf16 distance matmul): indices may differ only on
    #     near-ties; outputs must still be exact embedding rows of the indices.
    idx_bf, cv_bf = tokenizer_forward(x, enc_w, enc_b, codebooks, emb_table)
    jax.block_until_ready(cv_bf)
    assert idx_bf.shape == (B, T, num_codebooks)
    assert cv_bf.shape == (B, T, num_codebooks, d_model)
    assert jnp.allclose(cv_bf, emb_table[idx_bf], atol=1e-4, rtol=1e-4)

    print("KERNEL_OK")
</pallas_src>

<mosaic_0001>
module attributes {stable_mosaic.version = 11 : i64} {
  func.func @_tokenizer_kernel(%arg0: i32, %arg1: memref<8x64xf32, #tpu.memory_space<vmem>>, %arg2: memref<64x256xf32, #tpu.memory_space<vmem>>, %arg3: memref<1x256xf32, #tpu.memory_space<vmem>>, %arg4: memref<3x256x256xf32, #tpu.memory_space<vmem>>, %arg5: memref<3x1x256xf32, #tpu.memory_space<vmem>>, %arg6: memref<3x256x256xf32, #tpu.memory_space<vmem>>, %arg7: memref<256x256xf32, #tpu.memory_space<vmem>>, %arg8: memref<8x3xi32, #tpu.memory_space<vmem>>, %arg9: memref<8x768xf32, #tpu.memory_space<vmem>>) attributes {dimension_semantics = [#tpu.dimension_semantics<parallel>], iteration_bounds = array<i64: 2>, scalar_prefetch = 0 : i64, scratch_operands = 0 : i64, tpu.core_type = #tpu.core_type<tc>, window_params = [{transform_indices = @transform_0, window_bounds = array<i64: 8, 64>}, {pipeline_mode = #tpu.pipeline_mode<synchronous>, transform_indices = @transform_1, window_bounds = array<i64: 64, 256>}, {pipeline_mode = #tpu.pipeline_mode<synchronous>, transform_indices = @transform_2, window_bounds = array<i64: 1, 256>}, {pipeline_mode = #tpu.pipeline_mode<synchronous>, transform_indices = @transform_3, window_bounds = array<i64: 3, 256, 256>}, {pipeline_mode = #tpu.pipeline_mode<synchronous>, transform_indices = @transform_4, window_bounds = array<i64: 3, 1, 256>}, {pipeline_mode = #tpu.pipeline_mode<synchronous>, transform_indices = @transform_5, window_bounds = array<i64: 3, 256, 256>}, {pipeline_mode = #tpu.pipeline_mode<synchronous>, transform_indices = @transform_6, window_bounds = array<i64: 256, 256>}, {transform_indices = @transform_7, window_bounds = array<i64: 8, 3>}, {transform_indices = @transform_8, window_bounds = array<i64: 8, 768>}]} {
    %c0 = arith.constant 0 : index
    %c0_0 = arith.constant 0 : index
    %0 = vector.load %arg1[%c0, %c0_0] : memref<8x64xf32, #tpu.memory_space<vmem>>, vector<8x64xf32>
    %c0_1 = arith.constant 0 : index
    %c0_2 = arith.constant 0 : index
    %1 = vector.load %arg2[%c0_1, %c0_2] : memref<64x256xf32, #tpu.memory_space<vmem>>, vector<64x256xf32>
    %cst = arith.constant dense<0.000000e+00> : vector<8x256xf32>
    %2 = tpu.matmul %0, %1, %cst {dimension_numbers = #tpu.dot_dimension_numbers<[1], [0], [0], [1], [0, 0, 1, 1], [], []>} : vector<8x64xf32>, vector<64x256xf32>, vector<8x256xf32> -> vector<8x256xf32>
    %c0_3 = arith.constant 0 : index
    %c0_4 = arith.constant 0 : index
    %3 = vector.load %arg3[%c0_3, %c0_4] : memref<1x256xf32, #tpu.memory_space<vmem>>, vector<1x256xf32>
    %4 = vector.broadcast %3 : vector<1x256xf32> to vector<8x256xf32>
    %5 = arith.addf %2, %4 : vector<8x256xf32>
    %6 = tpu.iota {dimensions = array<i32: 1>} : vector<8x256xi32>
    %c0_5 = arith.constant 0 : index
    %c0_6 = arith.constant 0 : index
    %c0_7 = arith.constant 0 : index
    %7 = vector.load %arg4[%c0_5, %c0_6, %c0_7] : memref<3x256x256xf32, #tpu.memory_space<vmem>>, vector<1x256x256xf32>
    %8 = vector.shape_cast %7 : vector<1x256x256xf32> to vector<256x256xf32>
    %cst_8 = arith.constant dense<0.000000e+00> : vector<8x256xf32>
    %9 = tpu.matmul %5, %8, %cst_8 {dimension_numbers = #tpu.dot_dimension_numbers<[1], [0], [0], [1], [0, 0, 1, 1], [], []>} : vector<8x256xf32>, vector<256x256xf32>, vector<8x256xf32> -> vector<8x256xf32>
    %c0_9 = arith.constant 0 : index
    %c0_10 = arith.constant 0 : index
    %c0_11 = arith.constant 0 : index
    %10 = vector.load %arg5[%c0_9, %c0_10, %c0_11] : memref<3x1x256xf32, #tpu.memory_space<vmem>>, vector<1x1x256xf32>
    %11 = vector.shape_cast %10 : vector<1x1x256xf32> to vector<1x256xf32>
    %cst_12 = arith.constant 2.000000e+00 : f32
    %12 = vector.broadcast %cst_12 : f32 to vector<8x256xf32>
    %13 = arith.mulf %12, %9 : vector<8x256xf32>
    %14 = vector.broadcast %11 : vector<1x256xf32> to vector<8x256xf32>
    %15 = arith.subf %14, %13 : vector<8x256xf32>
    %16 = tpu.reduce_index %15 {axis = 1 : i32, kind = #tpu.reduction_kind<arg_min>} : vector<8x256xf32> -> vector<8xi32>
    %17 = vector.shape_cast %16 : vector<8xi32> to vector<8x1xi32>
    %18 = vector.broadcast %17 : vector<8x1xi32> to vector<8x256xi32>
    %19 = arith.cmpi eq, %6, %18 : vector<8x256xi32>
    %20 = arith.extui %19 : vector<8x256xi1> to vector<8x256xi32>
    %21 = arith.sitofp %20 : vector<8x256xi32> to vector<8x256xf32>
    %c0_13 = arith.constant 0 : index
    %c0_14 = arith.constant 0 : index
    %22 = vector.load %arg7[%c0_13, %c0_14] : memref<256x256xf32, #tpu.memory_space<vmem>>, vector<256x256xf32>
    %cst_15 = arith.constant dense<0.000000e+00> : vector<8x256xf32>
    %23 = tpu.matmul %21, %22, %cst_15 {dimension_numbers = #tpu.dot_dimension_numbers<[1], [0], [0], [1], [0, 0, 1, 1], [], []>} : vector<8x256xf32>, vector<256x256xf32>, vector<8x256xf32> -> vector<8x256xf32>
    %c0_16 = arith.constant 0 : index
    %c0_17 = arith.constant 0 : index
    %24 = vector.load %arg9[%c0_16, %c0_17] : memref<8x768xf32, #tpu.memory_space<vmem>>, vector<8x256xf32>
    tpu.vector_store %arg9[%c0_16, %c0_17], %23 {strides = array<i32>} : memref<8x768xf32, #tpu.memory_space<vmem>>, vector<8x256xf32>,
    %c0_18 = arith.constant 0 : index
    %c0_19 = arith.constant 0 : index
    %c0_20 = arith.constant 0 : index
    %25 = vector.load %arg6[%c0_18, %c0_19, %c0_20] : memref<3x256x256xf32, #tpu.memory_space<vmem>>, vector<1x256x256xf32>
    %26 = vector.shape_cast %25 : vector<1x256x256xf32> to vector<256x256xf32>
    %cst_21 = arith.constant dense<0.000000e+00> : vector<8x256xf32>
    %27 = tpu.matmul %21, %26, %cst_21 {dimension_numbers = #tpu.dot_dimension_numbers<[1], [0], [0], [1], [0, 0, 1, 1], [], []>} : vector<8x256xf32>, vector<256x256xf32>, vector<8x256xf32> -> vector<8x256xf32>
    %28 = arith.subf %5, %27 : vector<8x256xf32>
    %c1 = arith.constant 1 : index
    %c0_22 = arith.constant 0 : index
    %c0_23 = arith.constant 0 : index
    %29 = vector.load %arg4[%c1, %c0_22, %c0_23] : memref<3x256x256xf32, #tpu.memory_space<vmem>>, vector<1x256x256xf32>
    %30 = vector.shape_cast %29 : vector<1x256x256xf32> to vector<256x256xf32>
    %cst_24 = arith.constant dense<0.000000e+00> : vector<8x256xf32>
    %31 = tpu.matmul %28, %30, %cst_24 {dimension_numbers = #tpu.dot_dimension_numbers<[1], [0], [0], [1], [0, 0, 1, 1], [], []>} : vector<8x256xf32>, vector<256x256xf32>, vector<8x256xf32> -> vector<8x256xf32>
    %c1_25 = arith.constant 1 : index
    %c0_26 = arith.constant 0 : index
    %c0_27 = arith.constant 0 : index
    %32 = vector.load %arg5[%c1_25, %c0_26, %c0_27] : memref<3x1x256xf32, #tpu.memory_space<vmem>>, vector<1x1x256xf32>
    %33 = vector.shape_cast %32 : vector<1x1x256xf32> to vector<1x256xf32>
    %cst_28 = arith.constant 2.000000e+00 : f32
    %34 = vector.broadcast %cst_28 : f32 to vector<8x256xf32>
    %35 = arith.mulf %34, %31 : vector<8x256xf32>
    %36 = vector.broadcast %33 : vector<1x256xf32> to vector<8x256xf32>
    %37 = arith.subf %36, %35 : vector<8x256xf32>
    %38 = tpu.reduce_index %37 {axis = 1 : i32, kind = #tpu.reduction_kind<arg_min>} : vector<8x256xf32> -> vector<8xi32>
    %39 = vector.shape_cast %38 : vector<8xi32> to vector<8x1xi32>
    %40 = vector.broadcast %39 : vector<8x1xi32> to vector<8x256xi32>
    %41 = arith.cmpi eq, %6, %40 : vector<8x256xi32>
    %42 = arith.extui %41 : vector<8x256xi1> to vector<8x256xi32>
    %43 = arith.sitofp %42 : vector<8x256xi32> to vector<8x256xf32>
    %c0_29 = arith.constant 0 : index
    %c0_30 = arith.constant 0 : index
    %44 = vector.load %arg7[%c0_29, %c0_30] : memref<256x256xf32, #tpu.memory_space<vmem>>, vector<256x256xf32>
    %cst_31 = arith.constant dense<0.000000e+00> : vector<8x256xf32>
    %45 = tpu.matmul %43, %44, %cst_31 {dimension_numbers = #tpu.dot_dimension_numbers<[1], [0], [0], [1], [0, 0, 1, 1], [], []>} : vector<8x256xf32>, vector<256x256xf32>, vector<8x256xf32> -> vector<8x256xf32>
    %c0_32 = arith.constant 0 : index
    %c256 = arith.constant 256 : index
    %46 = vector.load %arg9[%c0_32, %c256] : memref<8x768xf32, #tpu.memory_space<vmem>>, vector<8x256xf32>
    tpu.vector_store %arg9[%c0_32, %c256], %45 {strides = array<i32>} : memref<8x768xf32, #tpu.memory_space<vmem>>, vector<8x256xf32>,
    %c1_33 = arith.constant 1 : index
    %c0_34 = arith.constant 0 : index
    %c0_35 = arith.constant 0 : index
    %47 = vector.load %arg6[%c1_33, %c0_34, %c0_35] : memref<3x256x256xf32, #tpu.memory_space<vmem>>, vector<1x256x256xf32>
    %48 = vector.shape_cast %47 : vector<1x256x256xf32> to vector<256x256xf32>
    %cst_36 = arith.constant dense<0.000000e+00> : vector<8x256xf32>
    %49 = tpu.matmul %43, %48, %cst_36 {dimension_numbers = #tpu.dot_dimension_numbers<[1], [0], [0], [1], [0, 0, 1, 1], [], []>} : vector<8x256xf32>, vector<256x256xf32>, vector<8x256xf32> -> vector<8x256xf32>
    %50 = arith.subf %28, %49 : vector<8x256xf32>
    %c2 = arith.constant 2 : index
    %c0_37 = arith.constant 0 : index
    %c0_38 = arith.constant 0 : index
    %51 = vector.load %arg4[%c2, %c0_37, %c0_38] : memref<3x256x256xf32, #tpu.memory_space<vmem>>, vector<1x256x256xf32>
    %52 = vector.shape_cast %51 : vector<1x256x256xf32> to vector<256x256xf32>
    %cst_39 = arith.constant dense<0.000000e+00> : vector<8x256xf32>
    %53 = tpu.matmul %50, %52, %cst_39 {dimension_numbers = #tpu.dot_dimension_numbers<[1], [0], [0], [1], [0, 0, 1, 1], [], []>} : vector<8x256xf32>, vector<256x256xf32>, vector<8x256xf32> -> vector<8x256xf32>
    %c2_40 = arith.constant 2 : index
    %c0_41 = arith.constant 0 : index
    %c0_42 = arith.constant 0 : index
    %54 = vector.load %arg5[%c2_40, %c0_41, %c0_42] : memref<3x1x256xf32, #tpu.memory_space<vmem>>, vector<1x1x256xf32>
    %55 = vector.shape_cast %54 : vector<1x1x256xf32> to vector<1x256xf32>
    %cst_43 = arith.constant 2.000000e+00 : f32
    %56 = vector.broadcast %cst_43 : f32 to vector<8x256xf32>
    %57 = arith.mulf %56, %53 : vector<8x256xf32>
    %58 = vector.broadcast %55 : vector<1x256xf32> to vector<8x256xf32>
    %59 = arith.subf %58, %57 : vector<8x256xf32>
    %60 = tpu.reduce_index %59 {axis = 1 : i32, kind = #tpu.reduction_kind<arg_min>} : vector<8x256xf32> -> vector<8xi32>
    %61 = vector.shape_cast %60 : vector<8xi32> to vector<8x1xi32>
    %62 = vector.broadcast %61 : vector<8x1xi32> to vector<8x256xi32>
    %63 = arith.cmpi eq, %6, %62 : vector<8x256xi32>
    %64 = arith.extui %63 : vector<8x256xi1> to vector<8x256xi32>
    %65 = arith.sitofp %64 : vector<8x256xi32> to vector<8x256xf32>
    %c0_44 = arith.constant 0 : index
    %c0_45 = arith.constant 0 : index
    %66 = vector.load %arg7[%c0_44, %c0_45] : memref<256x256xf32, #tpu.memory_space<vmem>>, vector<256x256xf32>
    %cst_46 = arith.constant dense<0.000000e+00> : vector<8x256xf32>
    %67 = tpu.matmul %65, %66, %cst_46 {dimension_numbers = #tpu.dot_dimension_numbers<[1], [0], [0], [1], [0, 0, 1, 1], [], []>} : vector<8x256xf32>, vector<256x256xf32>, vector<8x256xf32> -> vector<8x256xf32>
    %c0_47 = arith.constant 0 : index
    %c512 = arith.constant 512 : index
    %68 = vector.load %arg9[%c0_47, %c512] : memref<8x768xf32, #tpu.memory_space<vmem>>, vector<8x256xf32>
    tpu.vector_store %arg9[%c0_47, %c512], %67 {strides = array<i32>} : memref<8x768xf32, #tpu.memory_space<vmem>>, vector<8x256xf32>,
    %69 = tpu.concatenate %17, %39, %61 in 1 : vector<8x1xi32>, vector<8x1xi32>, vector<8x1xi32> -> vector<8x3xi32>
    %c0_48 = arith.constant 0 : index
    %c0_49 = arith.constant 0 : index
    %70 = vector.load %arg8[%c0_48, %c0_49] : memref<8x3xi32, #tpu.memory_space<vmem>>, vector<8x3xi32>
    tpu.vector_store %arg8[%c0_48, %c0_49], %69 {strides = array<i32>} : memref<8x3xi32, #tpu.memory_space<vmem>>, vector<8x3xi32>,
    return
  }
  func.func @transform_0(%arg0: i32) -> (i32, i32) {
    %c0_i32 = arith.constant 0 : i32
    %c0_i32_0 = arith.constant 0 : i32
    return %arg0, %c0_i32 : i32, i32
  }
  func.func @transform_1(%arg0: i32) -> (i32, i32) {
    %c0_i32 = arith.constant 0 : i32
    %c0_i32_0 = arith.constant 0 : i32
    %c0_i32_1 = arith.constant 0 : i32
    return %c0_i32, %c0_i32_0 : i32, i32
  }
  func.func @transform_2(%arg0: i32) -> (i32, i32) {
    %c0_i32 = arith.constant 0 : i32
    %c0_i32_0 = arith.constant 0 : i32
    %c0_i32_1 = arith.constant 0 : i32
    return %c0_i32, %c0_i32_0 : i32, i32
  }
  func.func @transform_3(%arg0: i32) -> (i32, i32, i32) {
    %c0_i32 = arith.constant 0 : i32
    %c0_i32_0 = arith.constant 0 : i32
    %c0_i32_1 = arith.constant 0 : i32
    %c0_i32_2 = arith.constant 0 : i32
    return %c0_i32, %c0_i32_0, %c0_i32_1 : i32, i32, i32
  }
  func.func @transform_4(%arg0: i32) -> (i32, i32, i32) {
    %c0_i32 = arith.constant 0 : i32
    %c0_i32_0 = arith.constant 0 : i32
    %c0_i32_1 = arith.constant 0 : i32
    %c0_i32_2 = arith.constant 0 : i32
    return %c0_i32, %c0_i32_0, %c0_i32_1 : i32, i32, i32
  }
  func.func @transform_5(%arg0: i32) -> (i32, i32, i32) {
    %c0_i32 = arith.constant 0 : i32
    %c0_i32_0 = arith.constant 0 : i32
    %c0_i32_1 = arith.constant 0 : i32
    %c0_i32_2 = arith.constant 0 : i32
    return %c0_i32, %c0_i32_0, %c0_i32_1 : i32, i32, i32
  }
  func.func @transform_6(%arg0: i32) -> (i32, i32) {
    %c0_i32 = arith.constant 0 : i32
    %c0_i32_0 = arith.constant 0 : i32
    %c0_i32_1 = arith.constant 0 : i32
    return %c0_i32, %c0_i32_0 : i32, i32
  }
  func.func @transform_7(%arg0: i32) -> (i32, i32) {
    %c0_i32 = arith.constant 0 : i32
    %c0_i32_0 = arith.constant 0 : i32
    return %arg0, %c0_i32 : i32, i32
  }
  func.func @transform_8(%arg0: i32) -> (i32, i32) {
    %c0_i32 = arith.constant 0 : i32
    %c0_i32_0 = arith.constant 0 : i32
    return %arg0, %c0_i32 : i32, i32
  }
}

</mosaic_0001>

<bundles_post_ra>
// kernel: tpu_custom_call.1
= control target key start
LH: loop header
LB: loop body
LE: loop exit
PB: predicated region body
PF: predicated region fallthrough
CT: control target
= control target key end

     0   :  { %s3336_s0 = inlined_call_operand.hbm [shape: f32[16,64], index: 0, kind: input, shape index: {}]   ;;  %s3337_s1 = inlined_call_operand.hbm [shape: f32[64,256], index: 1, kind: input, shape index: {}]   ;;  %s3338_s2 = inlined_call_operand.vmem [shape: f32[1,256], index: 2, kind: input, shape index: {}]   ;;  %s3339_s3 = inlined_call_operand.hbm [shape: f32[3,256,256], index: 3, kind: input, shape index: {}]   ;;  %s3340_s4 = inlined_call_operand.vmem [shape: f32[3,1,256], index: 4, kind: input, shape index: {}]   ;;  %s3341_s5 = inlined_call_operand.hbm [shape: f32[3,256,256], index: 5, kind: input, shape index: {}]   ;;  %s3342_s6 = inlined_call_operand.hbm [shape: f32[256,256], index: 6, kind: input, shape index: {}]   ;;  %s3343_s7 = inlined_call_operand.vmem [shape: s32[16,3], index: 7, kind: output, shape index: {0}]   ;;  %s3344_s8 = inlined_call_operand.hbm [shape: f32[16,768], index: 8, kind: output, shape index: {1}]  }
   0x1   :  { %3348 = sst [smem:[#allocation16_spill]] %s3337_s1 }
   0x2   :  { %14 = vsyncpa [#allocation3], 0 }
   0x3   :  { %16 = vsyncpa [#allocation3 + $0x1], 0 }
   0x4   :  { %17 = vsyncpa [#allocation6], 0 }
   0x5   :  { %18 = vsyncpa [#allocation9], 0 }
   0x6   :  { %19 = vsyncpa [#allocation4], 0 }
   0x7   :  { %21 = vsyncpa [#allocation4 + $0x1], 0  ;;  %s2777_s27 = smov 0   ;;  %s2779_s28 = smov 0  }
   0x8   :  { %s2781_s29 = smov 0   ;;  %s2783_s30 = smov 0  }
   0x9 LB: > { %s2722_s9 = smov [#allocation5]   ;;  %s2798_s11 = sadd.s32 4294967295, %s2720_s30   ;;  %s2720_s30 = sphi %s2783_s30, %s3370_s30   ;;  %s2716_s29 = sphi %s2781_s29, %s3369_s29   ;;  %s2712_s28 = sphi %s2779_s28, %s3368_s28   ;;  %s2708_s27 = sphi %s2777_s27, %s3367_s27  }
   0xa   : > { %s248_s10 = sshll.u32 %s2722_s9, 4  ;;  %p1843_p0 = scmp.ge.s32.totalorder %s2720_s30, 1  ;;  %s2803_s10 = int_to_ptr.vmem [resolvable:$true] %s248_s10 }
   0xb   : > { %p3345_p1 = scmp.eq.s32.totalorder %s2798_s11, 0  ;;  %p236_p2 = scmp.lt.s32.totalorder %s2720_s30, 3 }
   0xc   : > { %s2723_s13 = smov [#allocation8]   ;;  %s2724_s16 = smov [#allocation7]  }
   0xd   : > { %p2805_p3 = pnand %p1843_p0, %p236_p2  ;;  %s280_s14 = sshll.u32 %s2723_s13, 4  ;;  %s2818_s14 = int_to_ptr.vmem [resolvable:$true] %s280_s14 }
   0xe   : > { %s264_s17 = sshll.u32 %s2724_s16, 4  ;;  %s3351_s1 = sld [smem:[#allocation16_spill]]  ;;  %s2820_s17 = int_to_ptr.vmem [resolvable:$true] %s264_s17 }
   0xf   : > { %s3349_s12 = scalar_select %p2805_p3, 1, 0 }
  0x10   : > { %p2430_p5 = pneg %p2805_p3 }
  0x12   : > { %p2814_p6 = pnand %p2430_p5, %p3345_p1 }
  0x14   : > { %s2504_s20 = scalar_lea.hbm %s3351_s1, 2048  ;;  %p2830_p8 = pneg %p2814_p6 }
  0x15   : > { %p2505_p7 = scmp.ne.s32.totalorder %s3351_s1, %s2504_s20  ;;  %p2511_p11 = scmp.lt.u32.totalorder %s2504_s20, %s3351_s1 }
  0x17   : > { %p2507_p9 = pnand %p2830_p8, %p2505_p7 }
  0x19   : > { %p2508_p10 = pneg %p2507_p9 }
  0x1b   : > { %p2513_p12 = pnand %p2511_p11, %p2508_p10 }
  0x1d   : > { %2516 = shalt.err (!%p2513_p12)
}
  0x1e   : > { %s2517_s26 = scalar_lea.vmem %s2803_s10, 2048  ;;  %p2525_p5 = scmp.lt.s32.totalorder %s2803_s10, %s2803_s10 }
  0x1f   : > { %p2518_p13 = scmp.ne.s32.totalorder %s2803_s10, %s2517_s26  ;;  %p2526_p4 = scmp.lt.s32.totalorder %s2517_s26, %s2517_s26 }
  0x21   : > { %p2520_p0 = pnand %p2518_p13, %p2830_p8  ;;  %p2527_p7 = por %p2526_p4, %p2525_p5 }
  0x23   : > { %p2521_p2 = pneg %p2520_p0 }
  0x25   : > { %p2528_p9 = pnand %p2527_p7, %p2521_p2 }
  0x27   : > { %2531 = shalt.err (!%p2528_p9)
}
  0x28   : > { %s2725_s9 = smov 256   ;;  %s2726_s13 = smov 16  }
  0x29   : > { %2433 = dma.hbm_to_vmem [thread:$0]  (!%p2814_p6), %s3351_s1, 2048, %s2803_s10, [#allocation6], %s2725_s9, %s2725_s9, %s2726_s13  }
  0x2a   : > { %s2532_s21 = scalar_lea.hbm %s3341_s5, 24576 }
  0x2b   : > { %p2533_p4 = scmp.ne.s32.totalorder %s3341_s5, %s2532_s21  ;;  %p2539_p12 = scmp.lt.u32.totalorder %s2532_s21, %s3341_s5 }
  0x2d   : > { %p2535_p10 = pnand %p2533_p4, %p2830_p8 }
  0x2f   : > { %p2536_p11 = pneg %p2535_p10 }
  0x31   : > { %p2541_p13 = pnand %p2539_p12, %p2536_p11 }
  0x33   : > { %2544 = shalt.err (!%p2541_p13)
}
  0x34   : > { %s2545_s10 = scalar_lea.vmem %s2818_s14, 24576  ;;  %p2553_p7 = scmp.lt.s32.totalorder %s2818_s14, %s2818_s14 }
  0x35   : > { %p2546_p0 = scmp.ne.s32.totalorder %s2818_s14, %s2545_s10  ;;  %p2554_p9 = scmp.lt.s32.totalorder %s2545_s10, %s2545_s10 }
  0x37   : > { %p2548_p2 = pnand %p2546_p0, %p2830_p8  ;;  %p2555_p4 = por %p2554_p9, %p2553_p7 }
  0x39   : > { %p2549_p5 = pneg %p2548_p2 }
  0x3b   : > { %p2556_p10 = pnand %p2555_p4, %p2549_p5 }
  0x3d   : > { %2559 = shalt.err (!%p2556_p10)
}
  0x3e   : > { %2439 = dma.hbm_to_vmem [thread:$0]  (!%p2814_p6), %s3341_s5, 24576, %s2818_s14, [#allocation9], %s2725_s9, %s2725_s9, %s2726_s13  }
  0x3f   : > { %s2560_s21 = scalar_lea.hbm %s3339_s3, 24576 }
  0x40   : > { %p2561_p11 = scmp.ne.s32.totalorder %s3339_s3, %s2560_s21  ;;  %p2567_p0 = scmp.lt.u32.totalorder %s2560_s21, %s3339_s3 }
  0x42   : > { %p2563_p12 = pnand %p2561_p11, %p2830_p8 }
  0x44   : > { %p2564_p13 = pneg %p2563_p12 }
  0x46   : > { %p2569_p2 = pnand %p2567_p0, %p2564_p13 }
  0x48   : > { %2572 = shalt.err (!%p2569_p2)
}
  0x49   : > { %s2573_s14 = scalar_lea.vmem %s2820_s17, 24576  ;;  %p2581_p4 = scmp.lt.s32.totalorder %s2820_s17, %s2820_s17 }
  0x4a   : > { %p2574_p5 = scmp.ne.s32.totalorder %s2820_s17, %s2573_s14  ;;  %p2582_p10 = scmp.lt.s32.totalorder %s2573_s14, %s2573_s14 }
  0x4c   : > { %p2576_p7 = pnand %p2574_p5, %p2830_p8  ;;  %p2583_p11 = por %p2582_p10, %p2581_p4 }
  0x4e   : > { %p2577_p9 = pneg %p2576_p7 }
  0x50   : > { %p2584_p12 = pnand %p2583_p11, %p2577_p9 }
  0x52   : > { %2587 = shalt.err (!%p2584_p12)
}
  0x53   : > { %2436 = dma.hbm_to_vmem [thread:$0]  (!%p2814_p6), %s3339_s3, 24576, %s2820_s17, [#allocation6], %s2725_s9, %s2725_s9, %s2726_s13  }
  0x54   : > { %s2727_s18 = smov [#allocation10]   ;;  %s2588_s22 = scalar_lea.hbm %s3342_s6, 8192 }
  0x55   : > { %s293_s19 = sshll.u32 %s2727_s18, 4  ;;  %p2589_p13 = scmp.ne.s32.totalorder %s3342_s6, %s2588_s22  ;;  %s294_s19 = int_to_ptr.vmem [resolvable:$true] %s293_s19 }
  0x56   : > { %p2595_p5 = scmp.lt.u32.totalorder %s2588_s22, %s3342_s6 }
  0x57   : > { %p2591_p0 = pnand %p2589_p13, %p2830_p8 }
  0x59   : > { %p2592_p2 = pneg %p2591_p0 }
  0x5b   : > { %p2597_p7 = pnand %p2595_p5, %p2592_p2 }
  0x5d   : > { %2600 = shalt.err (!%p2597_p7)
}
  0x5e   : > { %s2601_s17 = scalar_lea.vmem %s294_s19, 8192  ;;  %p2609_p11 = scmp.lt.s32.totalorder %s294_s19, %s294_s19 }
  0x5f   : > { %p2602_p9 = scmp.ne.s32.totalorder %s294_s19, %s2601_s17  ;;  %p2610_p12 = scmp.lt.s32.totalorder %s2601_s17, %s2601_s17 }
  0x61   : > { %p2604_p4 = pnand %p2602_p9, %p2830_p8  ;;  %p2611_p1 = por %p2610_p12, %p2609_p11 }
  0x63   : > { %p2605_p10 = pneg %p2604_p4 }
  0x65   : > { %p2612_p3 = pnand %p2611_p1, %p2605_p10 }
  0x67   : > { %2615 = shalt.err (!%p2612_p3)
}
  0x68   : > { %2442 = dma.hbm_to_vmem [thread:$0]  (!%p2814_p6), %s3342_s6, 8192, %s294_s19, [#allocation9], %s2725_s9, %s2725_s9, %s2726_s13  }
  0x69   : > { %s1842_s15 = sadd.s32 4294967294, %s2720_s30   ;;  %s2929_s23 = sadd.s32 1, %s2720_s30  }
  0x6a   : > { %s31_s18 = ssub.s32 %s2720_s30, %s2929_s23  ;;  %s34_s20 = sadd.s32 1, %s2716_s29 }
  0x6b   : > { %p32_p1 = scmp.eq.s32.totalorder %s31_s18, 0  ;;  %p41_p3 = scmp.ne.s32.totalorder %s2716_s29, %s2712_s28 }
  0x6c   : > { %p42_p8 = scmp.eq.s32.totalorder %s2720_s30, 0  ;;  %p47_p13 = scmp.ne.s32.totalorder %s2712_s28, %s2708_s27 }
  0x6d   : > { %s2940_s21 = scalar_select %p32_p1, %s2716_s29, %s34_s20  }
  0x6e   : > { %p2942_p0 = por %p42_p8, %p41_p3  ;;  %p3354_p2 = scmp.eq.s32.totalorder %s2798_s11, 0 }
  0x6f   : > { %p223_p5 = scmp.eq.s32.totalorder %s2798_s11, 1  ;;  %p229_p7 = scmp.eq.s32.totalorder %s1842_s15, 1 }
  0x70   : > { %p2948_p6 = por %p3354_p2, %p47_p13  ;;  %p2455_p9 = scmp.lt.s32.totalorder %s2720_s30, 2 }
  0x71   : > { %s307_s13 = sand.u32 1, %s2716_s29   ;;  %p2955_p4 = por %p223_p5, %p41_p3 }
  0x72   : > { %p2959_p10 = por %p229_p7, %p47_p13  ;;  %s1849_s25 = sshll.u32 %s307_s13, 3 }
  0x73   : > { %s3356_s19 = scalar_select %p2955_p4, 1, 0 }
  0x74   : > { %s3357_s24 = scalar_select %p2959_p10, 1, 0 }
  0x75   : > { %s1850_s26 = sshll.u32 %s2720_s30, 7  ;;  %s311_s16 = scalar_lea.vmem [#allocation2], %s1849_s25 }
  0x76   : > { %s2967_s10 = scalar_lea.hbm %s3336_s0, %s1850_s26  ;;  %s318_s15 = sshll.u32 %s311_s16, 4  ;;  %s2969_s15 = int_to_ptr.vmem [resolvable:$true] %s318_s15 }
  0x77   : > { %p2973_p11 = pnand %p2455_p9, %p2942_p0  ;;  %s308_s20 = scalar_lea.sflag [#allocation3], %s307_s13 }
  0x78   : > { %s2616_s1 = scalar_lea.hbm %s2967_s10, 128  ;;  %s2621_s14 = scalar_lea.hbm %s3336_s0, 256 }
  0x79   : > { %p2617_p12 = scmp.ne.s32.totalorder %s2967_s10, %s2616_s1  ;;  %p2618_p1 = pneg %p2973_p11 }
  0x7a   : > { %p2622_p13 = scmp.lt.u32.totalorder %s2967_s10, %s3336_s0  ;;  %p2623_p0 = scmp.lt.u32.totalorder %s2621_s14, %s2616_s1 }
  0x7b   : > { %p2619_p3 = pnand %p2618_p1, %p2617_p12  ;;  %p2625_p5 = scmp.lt.u32.totalorder %s2616_s1, %s2967_s10 }
  0x7c   : > { %p2624_p2 = por %p2623_p0, %p2622_p13 }
  0x7d   : > { %p2620_p8 = pneg %p2619_p3 }
  0x7e   : > { %p2626_p7 = por %p2625_p5, %p2624_p2 }
  0x80   : > { %p2627_p9 = pnand %p2626_p7, %p2620_p8 }
  0x82   : > { %2630 = shalt.err (!%p2627_p9)
}
  0x83   : > { %s2631_s13 = scalar_lea.vmem %s2969_s15, 128  ;;  %s2728_s16 = smov [#allocation2]  }
  0x84   : > { %p2632_p12 = scmp.ne.s32.totalorder %s2969_s15, %s2631_s13  ;;  %s2636_s25 = sshll.u32 %s2728_s16, 4  ;;  %s2637_s25 = int_to_ptr.vmem [resolvable:$false] %s2636_s25 }
  0x85   : > { %s2638_s26 = scalar_lea.vmem %s2637_s25, 256  ;;  %p2639_p4 = scmp.lt.s32.totalorder %s2969_s15, %s2637_s25 }
  0x86   : > { %p2634_p3 = pnand %p2632_p12, %p2618_p1  ;;  %p2640_p13 = scmp.lt.s32.totalorder %s2638_s26, %s2631_s13 }
  0x88   : > { %p2635_p10 = pneg %p2634_p3  ;;  %p2641_p0 = por %p2640_p13, %p2639_p4 }
  0x8a   : > { %p2642_p2 = pnand %p2641_p0, %p2635_p10 }
  0x8c   : > { %2645 = shalt.err (!%p2642_p2)
}
  0x8d   : > { %2446 = dma.hbm_to_vmem [thread:$0]  (!%p2973_p11), %s2967_s10, 128, %s2969_s15, %s308_s20  }
  0x8e   : > { %p3359_p8 = scmp.ne.s32.totalorder %s3349_s12, 0 }
  0x8f   : > { %s3005_s1 = sand.u32 (!%p3359_p8), 1, %s2712_s28  }
  0x90   : > { %327 = sbr.rel (%p3359_p8) target bundleno = 2537 (0x9e9), region = 48  ;;  %s1852_s14 = sshll.u32 (!%p3359_p8), %s3005_s1, 3 }
  0x91   : > { %s330_s22 = scalar_lea.sflag (!%p3359_p8), [#allocation3], %s3005_s1  ;;  %s3009_s17 = scalar_lea.vmem (!%p3359_p8), [#allocation2], %s1852_s14 }
  0x97   : > { %2691 = dma.done.wait (%p2948_p6), %s330_s22, 128  }
  0x98   : > { %2693 = vsyncadd (%p2948_p6), %s330_s22, 4294967168  ;;  %p3360_p4 = scmp.eq.s32.totalorder %s2798_s11, 0 }
  0x9a   : > { %2695 = dma.done.wait (%p3360_p4), [#allocation6], 26624   ;;  %p3361_p10 = pmov %p3360_p4 }
  0x9b   : > { %p3362_p11 = pmov %p3360_p4 }
  0x9c   : > { %2697 = vsyncadd (%p3361_p10), [#allocation6], 4294940672 }
  0x9d   : > { %2699 = dma.done.wait (%p3362_p11), [#allocation9], 32768   ;;  %p3363_p1 = pmov %p3360_p4 }
  0x9e   : > { %v2729_v0 = vmov 0.0   ;;  %v392_v1 = vld [vmem:[#allocation5 + $0x8] sm:$0xff]  ;;  %v394_v2 = vld [vmem:[#allocation5 + $0x18] sm:$0xff]  ;;  %v391_v3 = vld [vmem:[#allocation5] sm:$0xff]  ;;  %vm419_vm0 = vcmask 523264   ;;  %s2408_s18 = smul.u32 48, %s3005_s1 }
  0x9f   : > { %2701 = vsyncadd (%p3363_p1), [#allocation9], 4294934528  ;;  %487 = vmatprep.mubr.f32.mxu0 %v2729_v0  ;;  %v1880_v4 = vpack.c.bf16 %v394_v2, %v392_v1  ;;  %v393_v5 = vld [vmem:[#allocation5 + $0x10] sm:$0xff]  ;;  %v396_v6 = vld [vmem:[#allocation5 + $0x28] sm:$0xff]  ;;  %p386_p6 = scmp.lt.s32.totalorder %s2798_s11, 1  ;;  %vm1682_vm8 = vcmask 7168  }
  0xa0   : > { %v398_v7 = vld [vmem:[#allocation5 + $0x38] sm:$0xff]  ;;  %v1882_v8 = vpack.c.bf16 %v393_v5, %v391_v3  ;;  %v395_v10 = vld [vmem:[#allocation5 + $0x20] sm:$0xff]  ;;  %v397_v11 = vld [vmem:[#allocation5 + $0x30] sm:$0xff]  ;;  %s3206_s20 = scalar_lea.vmem [#allocation11], %s2408_s18  ;;  %vm1684_vm9 = vcmask 15360   ;;  %vm1686_vm10 = vcmask 23552  }
  0xa1   : > { %v1884_v9 = vpack.c.bf16 %v398_v7, %v396_v6  ;;  %v400_v12 = vld [vmem:[#allocation5 + $0x48] sm:$0xff]  ;;  %1881 = vmatprep.subr.bf16.mxu0 %v1880_v4  ;;  %v402_v13 = vld [vmem:[#allocation5 + $0x58] sm:$0xff]  ;;  %v1886_v14 = vpack.c.bf16 %v397_v11, %v395_v10  ;;  %v399_v15 = vld [vmem:[#allocation5 + $0x40] sm:$0xff]  ;;  %s387_s14 = scalar_select %p386_p6, %s2798_s11, 1 }
  0xa2   : > { %1883 = vmatpush1.bf16.msra.mxu0 %v1882_v8  ;;  %v401_v16 = vld [vmem:[#allocation5 + $0x50] sm:$0xff]  ;;  %v1888_v17 = vpack.c.bf16 %v402_v13, %v400_v12  ;;  %v404_v18 = vld [vmem:[#allocation5 + $0x68] sm:$0xff]  ;;  %v406_v19 = vld [vmem:[#allocation5 + $0x78] sm:$0xff]  ;;  %s2409_s10 = smul.u32 768, %s2798_s11  ;;  %s1710_s15 = sshll.u32 %s3206_s20, 4  ;;  %s3292_s15 = int_to_ptr.vmem [resolvable:$true] %s1710_s15 }
  0xa3   : > { %1885 = vmatprep.subr.bf16.mxu0 %v1884_v9  ;;  %v498_v20 = vld [vmem:[#allocation7 + $0x8] sm:$0xff]  ;;  %v500_v21 = vld [vmem:[#allocation7 + $0x18] sm:$0xff]  ;;  %v497_v22 = vld [vmem:[#allocation7] sm:$0xff]  ;;  %v1890_v29 = vpack.c.bf16 %v401_v16, %v399_v15  ;;  %v1892_v34 = vpack.c.bf16 %v406_v19, %v404_v18  ;;  %s1857_s22 = sshll.u32 %s387_s14, 3  ;;  %s1693_s25 = scalar_lea.sflag [#allocation4], %s3005_s1 }
  0xa4   : > { %v499_v23 = vld [vmem:[#allocation7 + $0x10] sm:$0xff]  ;;  %v1896_v24 = vpack.c.bf16 %v500_v21, %v498_v20  ;;  %v502_v26 = vld [vmem:[#allocation7 + $0x28] sm:$0xff]  ;;  %v504_v27 = vld [vmem:[#allocation7 + $0x38] sm:$0xff]  ;;  %s389_s9 = scalar_lea.vmem %s3343_s7, %s1857_s22  ;;  %s3290_s16 = scalar_lea.hbm %s3344_s8, %s2409_s10 }
  0xa5   : > { %v1898_v25 = vpack.c.bf16 %v499_v23, %v497_v22  ;;  %v501_v28 = vld [vmem:[#allocation7 + $0x20] sm:$0xff]  ;;  %v1900_v30 = vpack.c.bf16 %v504_v27, %v502_v26  ;;  %v503_v31 = vld [vmem:[#allocation7 + $0x30] sm:$0xff]  ;;  %v506_v32 = vld [vmem:[#allocation7 + $0x48] sm:$0xff]  ;;  %s2646_s26 = scalar_lea.vmem %s3292_s15, 768  ;;  %p3364_p7 = scmp.ne.s32.totalorder %s3356_s19, 0 }
  0xa6   : > { %1887 = vmatpush1.bf16.msra.mxu0 %v1886_v14  ;;  %v508_v33 = vld [vmem:[#allocation7 + $0x58] sm:$0xff]  ;;  %v403_v35 = vld [vmem:[#allocation5 + $0x60] sm:$0xff]  ;;  %v405_v36 = vld [vmem:[#allocation5 + $0x70] sm:$0xff]  ;;  %1897 = vmatprep.subr.bf16.mxu1 %v1896_v24  ;;  %v1902_v37 = vpack.c.bf16 %v503_v31, %v501_v28  ;;  %p2647_p5 = scmp.ne.s32.totalorder %s3292_s15, %s2646_s26  ;;  %s2731_s11 = smov [#allocation11]  }
  0xa7   : > { %1889 = vmatprep.subr.bf16.mxu0 %v1888_v17  ;;  %1899 = vmatpush1.bf16.msra.mxu1 %v1898_v25  ;;  %v1904_v38 = vpack.c.bf16 %v508_v33, %v506_v32  ;;  %v505_v39 = vld [vmem:[#allocation7 + $0x40] sm:$0xff]  ;;  %v507_v40 = vld [vmem:[#allocation7 + $0x50] sm:$0xff]  ;;  %v1894_v41 = vpack.c.bf16 %v405_v36, %v403_v35  ;;  %v510_v42 = vld [vmem:[#allocation7 + $0x68] sm:$0xff]  ;;  %s2650_s14 = sshll.u32 %s2731_s11, 4  ;;  %s2651_s14 = int_to_ptr.vmem [resolvable:$false] %s2650_s14 }
  0xa8   : > { %1901 = vmatprep.subr.bf16.mxu1 %v1900_v30  ;;  %v512_v43 = vld [vmem:[#allocation7 + $0x78] sm:$0xff]  ;;  %v1906_v44 = vpack.c.bf16 %v507_v40, %v505_v39  ;;  %v509_v46 = vld [vmem:[#allocation7 + $0x60] sm:$0xff]  ;;  %v511_v47 = vld [vmem:[#allocation7 + $0x70] sm:$0xff]  ;;  %p2648_p9 = pnand %p2647_p5, %p3364_p7  ;;  %s2652_s22 = scalar_lea.vmem %s2651_s14, 1536 }
  0xa9   : > { %v1908_v45 = vpack.c.bf16 %v512_v43, %v510_v42  ;;  %v390_v48 = vld [vmem:[%s3009_s17] sm:$0xff]  ;;  %v514_v49 = vld [vmem:[#allocation7 + $0x88] sm:$0xff]  ;;  %v1910_v51 = vpack.c.bf16 %v511_v47, %v509_v46  ;;  %v513_v53 = vld [vmem:[#allocation7 + $0x80] sm:$0xff]  ;;  %p2653_p3 = scmp.lt.s32.totalorder %s3292_s15, %s2651_s14  ;;  %p2654_p13 = scmp.lt.s32.totalorder %s2652_s22, %s2646_s26 }
  0xaa   : > { %1891 = vmatpush1.bf16.msra.mxu0 %v1890_v29  ;;  %v516_v50 = vld [vmem:[#allocation7 + $0x98] sm:$0xff]  ;;  %v515_v54 = vld [vmem:[#allocation7 + $0x90] sm:$0xff]  ;;  %v518_v55 = vld [vmem:[#allocation7 + $0xa8] sm:$0xff]  ;;  %p2649_p12 = pneg %p2648_p9 }
  0xab   : > { %1893 = vmatprep.subr.bf16.mxu0 %v1892_v34  ;;  %1903 = vmatpush1.bf16.msra.mxu1 %v1902_v37  ;;  %v1912_v52 = vpack.c.bf16 %v516_v50, %v514_v49  ;;  %v520_v56 = vld [vmem:[#allocation7 + $0xb8] sm:$0xff]  ;;  %v1914_v57 = vpack.c.bf16 %v515_v54, %v513_v53  ;;  %v517_v59 = vld [vmem:[#allocation7 + $0xa0] sm:$0xff]  ;;  %v519_v60 = vld [vmem:[#allocation7 + $0xb0] sm:$0xff]  ;;  %p2655_p0 = por %p2654_p13, %p2653_p3 }
  0xac   : > { %1905 = vmatprep.subr.bf16.mxu1 %v1904_v38  ;;  %v1916_v58 = vpack.c.bf16 %v520_v56, %v518_v55  ;;  %v522_v61 = vld [vmem:[#allocation7 + $0xc8] sm:$0xff]  ;;  %v524_v62 = vld [vmem:[#allocation7 + $0xd8] sm:$0xff]  ;;  %v1918_v63 = vpack.c.bf16 %v519_v60, %v517_v59  ;;  %v521_v1 = vld [vmem:[#allocation7 + $0xc0] sm:$0xff] }
  0xad   : > { %v1920_v0 = vpack.c.bf16 %v524_v62, %v522_v61  ;;  %v523_v2 = vld [vmem:[#allocation7 + $0xd0] sm:$0xff]  ;;  %v526_v3 = vld [vmem:[#allocation7 + $0xe8] sm:$0xff]  ;;  %v528_v4 = vld [vmem:[#allocation7 + $0xf8] sm:$0xff]  ;;  %p2656_p2 = pnand %p2655_p0, %p2649_p12 }
  0xae   : > { %1895 = vmatpush1.bf16.msra.mxu0 %v1894_v41  ;;  %v1922_v5 = vpack.c.bf16 %v523_v2, %v521_v1  ;;  %v1924_v6 = vpack.c.bf16 %v528_v4, %v526_v3  ;;  %v525_v7 = vld [vmem:[#allocation7 + $0xe0] sm:$0xff]  ;;  %v527_v8 = vld [vmem:[#allocation7 + $0xf0] sm:$0xff]  ;;  %v530_v9 = vld [vmem:[#allocation7 + $0x108] sm:$0xff] }
  0xaf   : > { %1907 = vmatpush1.bf16.msra.mxu1 %v1906_v44  ;;  %v532_v10 = vld [vmem:[#allocation7 + $0x118] sm:$0xff]  ;;  %v1926_v11 = vpack.c.bf16 %v527_v8, %v525_v7  ;;  %v529_v13 = vld [vmem:[#allocation7 + $0x100] sm:$0xff]  ;;  %v531_v14 = vld [vmem:[#allocation7 + $0x110] sm:$0xff] }
  0xb0   : > { %1909 = vmatprep.subr.bf16.mxu1 %v1908_v45  ;;  %v1928_v12 = vpack.c.bf16 %v532_v10, %v530_v9  ;;  %v534_v15 = vld [vmem:[#allocation7 + $0x128] sm:$0xff]  ;;  %v536_v16 = vld [vmem:[#allocation7 + $0x138] sm:$0xff]  ;;  %v1930_v17 = vpack.c.bf16 %v531_v14, %v529_v13  ;;  %v533_v19 = vld [vmem:[#allocation7 + $0x120] sm:$0xff] }
  0xb1   : > { %1858 = vmatmul.mubr.msk.f32.vlgmr.msra.gmra.mrb[0].mxu0 %vm419_vm0, %v390_v48  ;;  %v1932_v18 = vpack.c.bf16 %v536_v16, %v534_v15  ;;  %v535_v20 = vld [vmem:[#allocation7 + $0x130] sm:$0xff]  ;;  %v538_v21 = vld [vmem:[#allocation7 + $0x148] sm:$0xff]  ;;  %v540_v22 = vld [vmem:[#allocation7 + $0x158] sm:$0xff] }
  0xb2   : > { %v1934_v23 = vpack.c.bf16 %v535_v20, %v533_v19  ;;  %v1936_v24 = vpack.c.bf16 %v540_v22, %v538_v21  ;;  %v537_v25 = vld [vmem:[#allocation7 + $0x140] sm:$0xff]  ;;  %v539_v26 = vld [vmem:[#allocation7 + $0x150] sm:$0xff]  ;;  %v542_v27 = vld [vmem:[#allocation7 + $0x168] sm:$0xff] }
  0xb3   : > { %1911 = vmatpush1.bf16.msra.mxu1 %v1910_v51  ;;  %v544_v28 = vld [vmem:[#allocation7 + $0x178] sm:$0xff]  ;;  %v1938_v29 = vpack.c.bf16 %v539_v26, %v537_v25  ;;  %v541_v31 = vld [vmem:[#allocation7 + $0x160] sm:$0xff]  ;;  %v543_v32 = vld [vmem:[#allocation7 + $0x170] sm:$0xff] }
  0xb4   : > { %1913 = vmatprep.subr.bf16.mxu1 %v1912_v52  ;;  %v1940_v30 = vpack.c.bf16 %v544_v28, %v542_v27  ;;  %v546_v33 = vld [vmem:[#allocation7 + $0x188] sm:$0xff]  ;;  %v548_v34 = vld [vmem:[#allocation7 + $0x198] sm:$0xff]  ;;  %v1942_v35 = vpack.c.bf16 %v543_v32, %v541_v31  ;;  %v545_v37 = vld [vmem:[#allocation7 + $0x180] sm:$0xff] }
  0xb5   : > { %v1944_v36 = vpack.c.bf16 %v548_v34, %v546_v33  ;;  %v547_v38 = vld [vmem:[#allocation7 + $0x190] sm:$0xff]  ;;  %v550_v39 = vld [vmem:[#allocation7 + $0x1a8] sm:$0xff]  ;;  %v552_v40 = vld [vmem:[#allocation7 + $0x1b8] sm:$0xff] }
  0xb6   : > { %v1946_v41 = vpack.c.bf16 %v547_v38, %v545_v37  ;;  %v1948_v42 = vpack.c.bf16 %v552_v40, %v550_v39  ;;  %v549_v43 = vld [vmem:[#allocation7 + $0x1a0] sm:$0xff]  ;;  %v551_v44 = vld [vmem:[#allocation7 + $0x1b0] sm:$0xff]  ;;  %v554_v45 = vld [vmem:[#allocation7 + $0x1c8] sm:$0xff] }
  0xb7   : > { %1915 = vmatpush1.bf16.msra.mxu1 %v1914_v57  ;;  %v556_v46 = vld [vmem:[#allocation7 + $0x1d8] sm:$0xff]  ;;  %v1950_v47 = vpack.c.bf16 %v551_v44, %v549_v43  ;;  %v553_v49 = vld [vmem:[#allocation7 + $0x1c0] sm:$0xff]  ;;  %v555_v50 = vld [vmem:[#allocation7 + $0x1d0] sm:$0xff] }
  0xb8   : > { %1917 = vmatprep.subr.bf16.mxu1 %v1916_v58  ;;  %v1952_v48 = vpack.c.bf16 %v556_v46, %v554_v45  ;;  %v1954_v51 = vpack.c.bf16 %v555_v50, %v553_v49  ;;  %v558_v52 = vld [vmem:[#allocation7 + $0x1e8] sm:$0xff]  ;;  %v560_v53 = vld [vmem:[#allocation7 + $0x1f8] sm:$0xff]  ;;  %v557_v55 = vld [vmem:[#allocation7 + $0x1e0] sm:$0xff]  ;;  %v409_v58 = vlaneseq }
  0xb9   : > { %v1956_v54 = vpack.c.bf16 %v560_v53, %v558_v52  ;;  %v559_v56 = vld [vmem:[#allocation7 + $0x1f0] sm:$0xff]  ;;  %v663_v15 = vld [vmem:[#allocation10 + $0x8] sm:$0xff]  ;;  %v665_v16 = vld [vmem:[#allocation10 + $0x18] sm:$0xff] }
  0xba   : > { %v1958_v57 = vpack.c.bf16 %v559_v56, %v557_v55  ;;  %v410_v59 = vshrl.u32 %v409_v58, 7  ;;  %v407_v61 = vld [vmem:[%s3338_s2] sm:$0x3]  ;;  %v802_v19 = vld [vmem:[#allocation8 + $0x18] sm:$0xff]  ;;  %v662_v20 = vld [vmem:[#allocation10] sm:$0xff] }
  0xbb   : > { %1919 = vmatpush1.bf16.msra.mxu1 %v1918_v63  ;;  %v664_v21 = vld [vmem:[#allocation10 + $0x10] sm:$0xff]  ;;  %v667_v26 = vld [vmem:[#allocation10 + $0x28] sm:$0xff]  ;;  %v669_v28 = vld [vmem:[#allocation10 + $0x38] sm:$0xff] }
  0xbc   : > { %1921 = vmatprep.subr.bf16.mxu1 %v1920_v0  ;;  %v3025_v60 = vsub.s32 1, %v410_v59  ;;  %v3030_v62 = vsub.s32 0, %v410_v59  ;;  %v801_v25 = vld [vmem:[#allocation8 + $0x10] sm:$0xff]  ;;  %v3062_v31 = vpack.c.bf16 %v669_v28, %v667_v26  ;;  %v666_v33 = vld [vmem:[#allocation10 + $0x20] sm:$0xff]  ;;  %v671_v38 = vld [vmem:[#allocation10 + $0x48] sm:$0xff] }
  0xbd   : > { %v668_v34 = vld [vmem:[#allocation10 + $0x30] sm:$0xff]  ;;  %v673_v39 = vld [vmem:[#allocation10 + $0x58] sm:$0xff]  ;;  %v670_v44 = vld [vmem:[#allocation10 + $0x40] sm:$0xff] }
  0xbe   : > { %v416_v63 = vrot.slane %v407_v61, %v3025_v60  ;;  %v412_v0 = vrot.slane %v407_v61, %v3030_v62  ;;  %v805_v37 = vld [vmem:[#allocation8 + $0x30] sm:$0xff]  ;;  %v810_v43 = vld [vmem:[#allocation8 + $0x58] sm:$0xff]  ;;  %v675_v50 = vld [vmem:[#allocation10 + $0x68] sm:$0xff] }
  0xbf   : > { %1923 = vmatpush1.bf16.msra.mxu1 %v1922_v5  ;;  %v632_v5 = vld [vmem:[%s3340_s4] sm:$0x3]  ;;  %v812_v52 = vld [vmem:[#allocation8 + $0x68] sm:$0xff]  ;;  %v814_v55 = vld [vmem:[#allocation8 + $0x78] sm:$0xff] }
  0xc0   : > { %1925 = vmatprep.subr.bf16.mxu1 %v1924_v6  ;;  %v639_v6 = vrot.slane %v632_v5, %v3030_v62  ;;  %v643_v8 = vrot.slane %v632_v5, %v3025_v60  ;;  %v672_v46 = vld [vmem:[#allocation10 + $0x50] sm:$0xff]  ;;  %v674_v56 = vld [vmem:[#allocation10 + $0x60] sm:$0xff]  ;;  %v2036_v59 = vpack.c.bf16 %v814_v55, %v812_v52  ;;  %v818_v5 = vld [vmem:[#allocation8 + $0x98] sm:$0xff] }
  0xc1   : > { %v3070_v49 = vpack.c.bf16 %v672_v46, %v670_v44  ;;  %v811_v61 = vld [vmem:[#allocation8 + $0x60] sm:$0xff]  ;;  %v684_v26 = vld [vmem:[#allocation10 + $0xb0] sm:$0xff]  ;;  %v693_v46 = vld [vmem:[#allocation10 + $0xf8] sm:$0xff] }
  0xc2   : > { %v825_v44 = vld [vmem:[#allocation8 + $0xd0] sm:$0xff] }
  0xc3   : > { %1927 = vmatpush1.bf16.msra.mxu1 %v1926_v11  ;;  %v692_v55 = vld [vmem:[#allocation10 + $0xf0] sm:$0xff] }
  0xc4   : > { %1929 = vmatprep.subr.bf16.mxu1 %v1928_v12 }
  0xc7   : > { %1931 = vmatpush1.bf16.msra.mxu1 %v1930_v17  ;;  %v800_v17 = vld [vmem:[#allocation8 + $0x8] sm:$0xff] }
  0xc8   : > { %1933 = vmatprep.subr.bf16.mxu1 %v1932_v18  ;;  %v3056_v18 = vpack.c.bf16 %v665_v16, %v663_v15  ;;  %v2024_v22 = vpack.c.bf16 %v802_v19, %v800_v17  ;;  %v817_v15 = vld [vmem:[#allocation8 + $0x90] sm:$0xff]  ;;  %v683_v16 = vld [vmem:[#allocation10 + $0xa8] sm:$0xff]  ;;  %v685_v17 = vld [vmem:[#allocation10 + $0xb8] sm:$0xff] }
  0xc9   : > { %v820_v19 = vld [vmem:[#allocation8 + $0xa8] sm:$0xff] }
  0xca   : > { %1961 = vmatprep.subr.bf16.mxu0 %v3056_v18 }
  0xcb   : > { %1935 = vmatpush1.bf16.msra.mxu1 %v1934_v23  ;;  %v3058_v23 = vpack.c.bf16 %v664_v21, %v662_v20  ;;  %v822_v20 = vld [vmem:[#allocation8 + $0xb8] sm:$0xff] }
  0xcc   : > { %1937 = vmatprep.subr.bf16.mxu1 %v1936_v24  ;;  %v799_v24 = vld [vmem:[#allocation8] sm:$0xff]  ;;  %v2044_v28 = vpack.c.bf16 %v822_v20, %v820_v19  ;;  %v836_v19 = vld [vmem:[#allocation8 + $0x128] sm:$0xff]  ;;  %v838_v20 = vld [vmem:[#allocation8 + $0x138] sm:$0xff] }
  0xcd   : > { %v2026_v27 = vpack.c.bf16 %v801_v25, %v799_v24  ;;  %1963 = vmatpush1.bf16.msra.mxu0 %v3058_v23  ;;  %v3085_v24 = vpack.c.bf16 %v685_v17, %v683_v16  ;;  %v682_v25 = vld [vmem:[#allocation10 + $0xa0] sm:$0xff]  ;;  %v699_v16 = vld [vmem:[#allocation10 + $0x128] sm:$0xff]  ;;  %v701_v17 = vld [vmem:[#allocation10 + $0x138] sm:$0xff] }
  0xce   : > { %1965 = vmatprep.subr.bf16.mxu0 %v3062_v31 }
  0xcf   : > { %1939 = vmatpush1.bf16.msra.mxu1 %v1938_v29  ;;  %v804_v29 = vld [vmem:[#allocation8 + $0x28] sm:$0xff] }
  0xd0   : > { %1941 = vmatprep.subr.bf16.mxu1 %v1940_v30  ;;  %v806_v30 = vld [vmem:[#allocation8 + $0x38] sm:$0xff] }
  0xd1   : > { %v2028_v32 = vpack.c.bf16 %v806_v30, %v804_v29  ;;  %v821_v29 = vld [vmem:[#allocation8 + $0xb0] sm:$0xff]  ;;  %v687_v30 = vld [vmem:[#allocation10 + $0xc8] sm:$0xff] }
  0xd3   : > { %1943 = vmatpush1.bf16.msra.mxu1 %v1942_v35  ;;  %v803_v35 = vld [vmem:[#allocation8 + $0x20] sm:$0xff] }
  0xd4   : > { %1945 = vmatprep.subr.bf16.mxu1 %v1944_v36  ;;  %v3064_v36 = vpack.c.bf16 %v668_v34, %v666_v33  ;;  %v2030_v40 = vpack.c.bf16 %v805_v37, %v803_v35  ;;  %v824_v33 = vld [vmem:[#allocation8 + $0xc8] sm:$0xff]  ;;  %v826_v34 = vld [vmem:[#allocation8 + $0xd8] sm:$0xff]  ;;  %v3088_v35 = vpack.c.bf16 %v684_v26, %v682_v25  ;;  %v3109_v26 = vpack.c.bf16 %v701_v17, %v699_v16 }
  0xd6   : > { %1967 = vmatpush1.bf16.msra.mxu0 %v3064_v36 }
  0xd7   : > { %1947 = vmatpush1.bf16.msra.mxu1 %v1946_v41  ;;  %v3067_v41 = vpack.c.bf16 %v673_v39, %v671_v38  ;;  %v686_v39 = vld [vmem:[#allocation10 + $0xc0] sm:$0xff] }
  0xd8   : > { %1949 = vmatprep.subr.bf16.mxu1 %v1948_v42  ;;  %v808_v42 = vld [vmem:[#allocation8 + $0x48] sm:$0xff] }
  0xd9   : > { %v2032_v45 = vpack.c.bf16 %v810_v43, %v808_v42  ;;  %1969 = vmatprep.subr.bf16.mxu0 %v3067_v41  ;;  %v823_v42 = vld [vmem:[#allocation8 + $0xc0] sm:$0xff]  ;;  %v2048_v43 = vpack.c.bf16 %v826_v34, %v824_v33  ;;  %v703_v33 = vld [vmem:[#allocation10 + $0x148] sm:$0xff]  ;;  %v705_v34 = vld [vmem:[#allocation10 + $0x158] sm:$0xff] }
  0xda   : > { %1971 = vmatpush1.bf16.msra.mxu0 %v3070_v49 }
  0xdb   : > { %1951 = vmatpush1.bf16.msra.mxu1 %v1950_v47  ;;  %v807_v47 = vld [vmem:[#allocation8 + $0x40] sm:$0xff] }
  0xdc   : > { %1953 = vmatprep.subr.bf16.mxu1 %v1952_v48  ;;  %v809_v48 = vld [vmem:[#allocation8 + $0x50] sm:$0xff] }
  0xdd   : > { %v2034_v53 = vpack.c.bf16 %v809_v48, %v807_v47  ;;  %v828_v47 = vld [vmem:[#allocation8 + $0xe8] sm:$0xff]  ;;  %v830_v48 = vld [vmem:[#allocation8 + $0xf8] sm:$0xff] }
  0xdf   : > { %1955 = vmatpush1.bf16.msra.mxu1 %v1954_v51  ;;  %v677_v51 = vld [vmem:[#allocation10 + $0x78] sm:$0xff] }
  0xe0   : > { %1957 = vmatprep.subr.bf16.mxu1 %v1956_v54  ;;  %v3073_v54 = vpack.c.bf16 %v677_v51, %v675_v50  ;;  %v2050_v51 = vpack.c.bf16 %v825_v44, %v823_v42  ;;  %v702_v44 = vld [vmem:[#allocation10 + $0x140] sm:$0xff] }
  0xe2   : > { %1973 = vmatprep.subr.bf16.mxu0 %v3073_v54 }
  0xe3   : > { %1959 = vmatpush1.bf16.msra.mxu1 %v1958_v57  ;;  %v676_v57 = vld [vmem:[#allocation10 + $0x70] sm:$0xff] }
  0xe4   : > { %2025 = vmatprep.subr.bf16.mxu1 %v2024_v22 }
 0x184   : > { %v489_v1 = vpop.f32.mrb[0].mxu0 }
 0x185   : > { %v491_v2 = vpop.f32.mrb[1].mxu0  ;;  %v3036_v4 = vadd.f32 %v489_v1, %v412_v0  ;;  %v679_v0 = vld [vmem:[#allocation10 + $0x88] sm:$0xff]  ;;  %v681_v1 = vld [vmem:[#allocation10 + $0x98] sm:$0xff] }
 0x186   : > { %v3034_v3 = vadd.f32 %v491_v2, %v416_v63  ;;  %v813_v63 = vld [vmem:[#allocation8 + $0x70] sm:$0xff]  ;;  %v816_v2 = vld [vmem:[#allocation8 + $0x88] sm:$0xff] }
 0x188   : > { %625 = vmatprep.mubr.f32.mxu1 %v3034_v3 }
 0x189   : > { %626 = vmatmul.mubr.f32.vlgmr.msra.gmra.mrb[0].mxu1 %v3036_v4 }
 0x18a   : > { %2027 = vmatpush1.bf16.msra.mxu1 %v2026_v27  ;;  %v819_v27 = vld [vmem:[#allocation8 + $0xa0] sm:$0xff] }
 0x18b   : > { %2029 = vmatprep.subr.bf16.mxu1 %v2028_v32  ;;  %v689_v32 = vld [vmem:[#allocation10 + $0xd8] sm:$0xff]  ;;  %v2046_v37 = vpack.c.bf16 %v821_v29, %v819_v27  ;;  %v698_v27 = vld [vmem:[#allocation10 + $0x120] sm:$0xff] }
 0x18c   : > { %v3091_v38 = vpack.c.bf16 %v689_v32, %v687_v30  ;;  %v835_v29 = vld [vmem:[#allocation8 + $0x120] sm:$0xff]  ;;  %v2060_v30 = vpack.c.bf16 %v838_v20, %v836_v19  ;;  %v837_v32 = vld [vmem:[#allocation8 + $0x130] sm:$0xff] }
 0x18d   : > { %v2062_v42 = vpack.c.bf16 %v837_v32, %v835_v29  ;;  %v710_v20 = vld [vmem:[#allocation10 + $0x180] sm:$0xff]  ;;  %v849_v29 = vld [vmem:[#allocation8 + $0x190] sm:$0xff]  ;;  %v717_v32 = vld [vmem:[#allocation10 + $0x1b8] sm:$0xff] }
 0x18e   : > { %2031 = vmatpush1.bf16.msra.mxu1 %v2030_v40  ;;  %v688_v40 = vld [vmem:[#allocation10 + $0xd0] sm:$0xff] }
 0x18f   : > { %2033 = vmatprep.subr.bf16.mxu1 %v2032_v45  ;;  %v691_v45 = vld [vmem:[#allocation10 + $0xe8] sm:$0xff]  ;;  %v3094_v50 = vpack.c.bf16 %v688_v40, %v686_v39  ;;  %v842_v39 = vld [vmem:[#allocation8 + $0x158] sm:$0xff] }
 0x190   : > { %v3097_v52 = vpack.c.bf16 %v693_v46, %v691_v45  ;;  %v704_v45 = vld [vmem:[#allocation10 + $0x150] sm:$0xff]  ;;  %v839_v46 = vld [vmem:[#allocation8 + $0x140] sm:$0xff] }
 0x192   : > { %2035 = vmatpush1.bf16.msra.mxu1 %v2034_v53  ;;  %v690_v53 = vld [vmem:[#allocation10 + $0xe0] sm:$0xff] }
 0x193   : > { %2037 = vmatprep.subr.bf16.mxu1 %v2036_v59  ;;  %v829_v59 = vld [vmem:[#allocation8 + $0xf0] sm:$0xff] }
 0x25c   : > { %v627_v7 = vpop.f32.mrb[0].mxu1 }
 0x25d   : > { %v633_v9 = vmul.f32 2.0, %v627_v7  ;;  %v629_v10 = vpop.f32.mrb[1].mxu1  ;;  %v2038_v7 = vpack.c.bf16 %v813_v63, %v811_v61  ;;  %v695_v61 = vld [vmem:[#allocation10 + $0x108] sm:$0xff]  ;;  %v697_v63 = vld [vmem:[#allocation10 + $0x118] sm:$0xff] }
 0x25e   : > { %v634_v11 = vmul.f32 2.0, %v629_v10  ;;  %v680_v10 = vld [vmem:[#allocation10 + $0x90] sm:$0xff] }
 0x25f   : > { %v3045_v12 = vsub.f32 %v639_v6, %v633_v9  ;;  %v3076_v6 = vpack.c.bf16 %v676_v57, %v674_v56  ;;  %v678_v9 = vld [vmem:[#allocation10 + $0x80] sm:$0xff]  ;;  %2039 = vmatpush1.bf16.msra.mxu1 %v2038_v7  ;;  %v2052_v57 = vpack.c.bf16 %v830_v48, %v828_v47  ;;  %v3103_v7 = vpack.c.bf16 %v697_v63, %v695_v61  ;;  %v841_v48 = vld [vmem:[#allocation8 + $0x150] sm:$0xff] }
 0x260   : > { %v3047_v13 = vsub.f32 %v643_v8, %v634_v11  ;;  %v3079_v8 = vpack.c.bf16 %v681_v1, %v679_v0  ;;  %v815_v11 = vld [vmem:[#allocation8 + $0x80] sm:$0xff]  ;;  %v3082_v21 = vpack.c.bf16 %v680_v10, %v678_v9  ;;  %v832_v0 = vld [vmem:[#allocation8 + $0x108] sm:$0xff]  ;;  %v834_v1 = vld [vmem:[#allocation8 + $0x118] sm:$0xff] }
 0x261   : > { %1975 = vmatpush1.bf16.msra.mxu0 %v3076_v6  ;;  %v2042_v22 = vpack.c.bf16 %v817_v15, %v815_v11  ;;  %v827_v56 = vld [vmem:[#allocation8 + $0xe0] sm:$0xff]  ;;  %v696_v10 = vld [vmem:[#allocation10 + $0x110] sm:$0xff] }
 0x262   : > { %vm648_vm1 = vcmp.le.f32.partialorder %v3045_v12, %v3047_v13  ;;  %1977 = vmatprep.subr.bf16.mxu0 %v3079_v8  ;;  %v694_v9 = vld [vmem:[#allocation10 + $0x100] sm:$0xff]  ;;  %v833_v15 = vld [vmem:[#allocation8 + $0x110] sm:$0xff] }
 0x263   : > { %v649_v14 = vsel %vm648_vm1, %v3045_v12, %v3047_v13  ;;  %v831_v11 = vld [vmem:[#allocation8 + $0x100] sm:$0xff] }
 0x264   : > { %651 = vmin.index.xlane.f32.xlu0 %v649_v14  ;;  %v2040_v14 = vpack.c.bf16 %v818_v5, %v816_v2  ;;  %v3100_v2 = vpack.c.bf16 %v692_v55, %v690_v53  ;;  %v2054_v5 = vpack.c.bf16 %v829_v59, %v827_v56  ;;  %v2058_v25 = vpack.c.bf16 %v833_v15, %v831_v11  ;;  %v709_v53 = vld [vmem:[#allocation10 + $0x178] sm:$0xff]  ;;  %v844_v55 = vld [vmem:[#allocation8 + $0x168] sm:$0xff]  ;;  %v706_v63 = vld [vmem:[#allocation10 + $0x160] sm:$0xff] }
 0x265   : > { %1979 = vmatpush1.bf16.msra.mxu0 %v3082_v21  ;;  %v846_v56 = vld [vmem:[#allocation8 + $0x178] sm:$0xff]  ;;  %v2066_v59 = vpack.c.bf16 %v841_v48, %v839_v46  ;;  %v851_v46 = vld [vmem:[#allocation8 + $0x1a0] sm:$0xff]  ;;  %v853_v48 = vld [vmem:[#allocation8 + $0x1b0] sm:$0xff] }
 0x266   : > { %2041 = vmatprep.subr.bf16.mxu1 %v2040_v14  ;;  %1981 = vmatprep.subr.bf16.mxu0 %v3085_v24  ;;  %v2056_v14 = vpack.c.bf16 %v834_v1, %v832_v0  ;;  %v708_v0 = vld [vmem:[#allocation10 + $0x170] sm:$0xff]  ;;  %v843_v1 = vld [vmem:[#allocation8 + $0x160] sm:$0xff]  ;;  %v713_v11 = vld [vmem:[#allocation10 + $0x198] sm:$0xff] }
 0x267   : > { %2043 = vmatpush1.bf16.msra.mxu1 %v2042_v22  ;;  %v3106_v22 = vpack.c.bf16 %v696_v10, %v694_v9  ;;  %v845_v9 = vld [vmem:[#allocation8 + $0x170] sm:$0xff]  ;;  %v711_v10 = vld [vmem:[#allocation10 + $0x188] sm:$0xff]  ;;  %v850_v15 = vld [vmem:[#allocation8 + $0x198] sm:$0xff]  ;;  %v3124_v16 = vpack.c.bf16 %v708_v0, %v706_v63  ;;  %v2078_v63 = vpack.c.bf16 %v853_v48, %v851_v46 }
 0x268   : > { %2045 = vmatprep.subr.bf16.mxu1 %v2044_v28  ;;  %v700_v28 = vld [vmem:[#allocation10 + $0x130] sm:$0xff]  ;;  %v2070_v17 = vpack.c.bf16 %v845_v9, %v843_v1  ;;  %v3127_v19 = vpack.c.bf16 %v713_v11, %v711_v10  ;;  %v718_v1 = vld [vmem:[#allocation10 + $0x1c0] sm:$0xff] }
 0x269   : > { %1983 = vmatpush1.bf16.msra.mxu0 %v3088_v35  ;;  %v3112_v40 = vpack.c.bf16 %v700_v28, %v698_v27  ;;  %v847_v27 = vld [vmem:[#allocation8 + $0x180] sm:$0xff]  ;;  %v857_v11 = vld [vmem:[#allocation8 + $0x1d0] sm:$0xff] }
 0x26a   : > { %1985 = vmatprep.subr.bf16.mxu0 %v3091_v38  ;;  %v855_v9 = vld [vmem:[#allocation8 + $0x1c0] sm:$0xff] }
 0x26b   : > { %2047 = vmatpush1.bf16.msra.mxu1 %v2046_v37  ;;  %v840_v37 = vld [vmem:[#allocation8 + $0x148] sm:$0xff]  ;;  %v941_v13 = vld [vmem:[#allocation7 + $0x220] sm:$0xff] }
 0x26c   : > { %2049 = vmatprep.subr.bf16.mxu1 %v2048_v43  ;;  %v3115_v43 = vpack.c.bf16 %v705_v34, %v703_v33  ;;  %v2064_v47 = vpack.c.bf16 %v842_v39, %v840_v37  ;;  %v852_v33 = vld [vmem:[#allocation8 + $0x1a8] sm:$0xff]  ;;  %v854_v34 = vld [vmem:[#allocation8 + $0x1b8] sm:$0xff]  ;;  %v2074_v39 = vpack.c.bf16 %v849_v29, %v847_v27  ;;  %v2082_v27 = vpack.c.bf16 %v857_v11, %v855_v9  ;;  %v722_v29 = vld [vmem:[#allocation10 + $0x1e0] sm:$0xff] }
 0x26d   : > { %1987 = vmatpush1.bf16.msra.mxu0 %v3094_v50  ;;  %v943_v9 = vld [vmem:[#allocation7 + $0x230] sm:$0xff]  ;;  %v946_v11 = vld [vmem:[#allocation7 + $0x248] sm:$0xff] }
 0x26e   : > { %1989 = vmatprep.subr.bf16.mxu0 %v3097_v52 }
 0x26f   : > { %2051 = vmatpush1.bf16.msra.mxu1 %v2050_v51  ;;  %v707_v51 = vld [vmem:[#allocation10 + $0x168] sm:$0xff] }
 0x270   : > { %2053 = vmatprep.subr.bf16.mxu1 %v2052_v57  ;;  %v3118_v57 = vpack.c.bf16 %v704_v45, %v702_v44  ;;  %v3121_v61 = vpack.c.bf16 %v709_v53, %v707_v51  ;;  %v714_v44 = vld [vmem:[#allocation10 + $0x1a0] sm:$0xff]  ;;  %v716_v45 = vld [vmem:[#allocation10 + $0x1b0] sm:$0xff]  ;;  %v719_v51 = vld [vmem:[#allocation10 + $0x1c8] sm:$0xff] }
 0x271   : > { %1991 = vmatpush1.bf16.msra.mxu0 %v3100_v2  ;;  %v721_v53 = vld [vmem:[#allocation10 + $0x1d8] sm:$0xff] }
 0x272   : > { %1993 = vmatprep.subr.bf16.mxu0 %v3103_v7  ;;  %v3139_v0 = vpack.c.bf16 %v721_v53, %v719_v51  ;;  %v938_v51 = vld [vmem:[#allocation7 + $0x208] sm:$0xff]  ;;  %v940_v53 = vld [vmem:[#allocation7 + $0x218] sm:$0xff] }
 0x273   : > { %2055 = vmatpush1.bf16.msra.mxu1 %v2054_v5  ;;  %v2068_v5 = vpack.c.bf16 %v846_v56, %v844_v55  ;;  %v856_v55 = vld [vmem:[#allocation8 + $0x1c8] sm:$0xff]  ;;  %v858_v56 = vld [vmem:[#allocation8 + $0x1d8] sm:$0xff] }
 0x274   : > { %2057 = vmatprep.subr.bf16.mxu1 %v2056_v14  ;;  %v848_v14 = vld [vmem:[#allocation8 + $0x188] sm:$0xff]  ;;  %v2080_v10 = vpack.c.bf16 %v858_v56, %v856_v55  ;;  %v2088_v55 = vpack.c.bf16 %v940_v53, %v938_v51  ;;  %v939_v56 = vld [vmem:[#allocation7 + $0x210] sm:$0xff]  ;;  %v953_v51 = vld [vmem:[#allocation7 + $0x280] sm:$0xff] }
 0x275   : > { %1995 = vmatpush1.bf16.msra.mxu0 %v3106_v22  ;;  %v2072_v28 = vpack.c.bf16 %v850_v15, %v848_v14  ;;  %v723_v14 = vld [vmem:[#allocation10 + $0x1e8] sm:$0xff]  ;;  %v725_v15 = vld [vmem:[#allocation10 + $0x1f8] sm:$0xff]  ;;  %v955_v53 = vld [vmem:[#allocation7 + $0x290] sm:$0xff] }
 0x276   : > { %1997 = vmatprep.subr.bf16.mxu0 %v3109_v26 }
 0x277   : > { %2059 = vmatpush1.bf16.msra.mxu1 %v2058_v25  ;;  %v712_v25 = vld [vmem:[#allocation10 + $0x190] sm:$0xff] }
 0x278   : > { %2061 = vmatprep.subr.bf16.mxu1 %v2060_v30  ;;  %v715_v30 = vld [vmem:[#allocation10 + $0x1a8] sm:$0xff]  ;;  %v3130_v37 = vpack.c.bf16 %v712_v25, %v710_v20  ;;  %v862_v20 = vld [vmem:[#allocation8 + $0x1f8] sm:$0xff] }
 0x279   : > { %1999 = vmatpush1.bf16.msra.mxu0 %v3112_v40 }
 0x27a   : > { %2001 = vmatprep.subr.bf16.mxu0 %v3115_v43 }
 0x27b   : > { %2063 = vmatpush1.bf16.msra.mxu1 %v2062_v42  ;;  %v3133_v42 = vpack.c.bf16 %v717_v32, %v715_v30  ;;  %v724_v30 = vld [vmem:[#allocation10 + $0x1f0] sm:$0xff] }
 0x27c   : > { %2065 = vmatprep.subr.bf16.mxu1 %v2064_v47  ;;  %v2076_v47 = vpack.c.bf16 %v854_v34, %v852_v33  ;;  %v859_v33 = vld [vmem:[#allocation8 + $0x1e0] sm:$0xff]  ;;  %v861_v34 = vld [vmem:[#allocation8 + $0x1f0] sm:$0xff] }
 0x27d   : > { %2003 = vmatpush1.bf16.msra.mxu0 %v3118_v57 }
 0x27e   : > { %2005 = vmatprep.subr.bf16.mxu0 %v3121_v61 }
 0x27f   : > { %2067 = vmatpush1.bf16.msra.mxu1 %v2066_v59  ;;  %v3136_v59 = vpack.c.bf16 %v716_v45, %v714_v44  ;;  %v2086_v44 = vpack.c.bf16 %v861_v34, %v859_v33  ;;  %v3154_v45 = vand.u32 127, %v409_v58  ;;  %v942_v58 = vld [vmem:[#allocation7 + $0x228] sm:$0xff]  ;;  %v949_v34 = vld [vmem:[#allocation7 + $0x260] sm:$0xff] }
 0x280   : > { %2069 = vmatprep.subr.bf16.mxu1 %v2068_v5  ;;  %v720_v5 = vld [vmem:[#allocation10 + $0x1d0] sm:$0xff] }
 0x281   : > { %2007 = vmatpush1.bf16.msra.mxu0 %v3124_v16  ;;  %v3142_v25 = vpack.c.bf16 %v720_v5, %v718_v1 }
 0x282   : > { %2009 = vmatprep.subr.bf16.mxu0 %v3127_v19 }
 0x283   : > { %2071 = vmatpush1.bf16.msra.mxu1 %v2070_v17  ;;  %v860_v17 = vld [vmem:[#allocation8 + $0x1e8] sm:$0xff] }
 0x284   : > { %2073 = vmatprep.subr.bf16.mxu1 %v2072_v28  ;;  %v3145_v28 = vpack.c.bf16 %v725_v15, %v723_v14  ;;  %v2084_v32 = vpack.c.bf16 %v862_v20, %v860_v17  ;;  %v948_v14 = vld [vmem:[#allocation7 + $0x258] sm:$0xff]  ;;  %v2094_v15 = vpack.c.bf16 %v943_v9, %v941_v13  ;;  %v945_v20 = vld [vmem:[#allocation7 + $0x240] sm:$0xff]  ;;  %v963_v13 = vld [vmem:[#allocation7 + $0x2d0] sm:$0xff] }
 0x285   : > { %2011 = vmatpush1.bf16.msra.mxu0 %v3130_v37  ;;  %v2096_v17 = vpack.c.bf16 %v948_v14, %v946_v11  ;;  %v966_v9 = vld [vmem:[#allocation7 + $0x2e8] sm:$0xff]  ;;  %v965_v14 = vld [vmem:[#allocation7 + $0x2e0] sm:$0xff] }
 0x286   : > { %2013 = vmatprep.subr.bf16.mxu0 %v3133_v42 }
 0x287   : > { %2075 = vmatpush1.bf16.msra.mxu1 %v2074_v39  ;;  %v3148_v39 = vpack.c.bf16 %v724_v30, %v722_v29  ;;  %v950_v29 = vld [vmem:[#allocation7 + $0x268] sm:$0xff]  ;;  %v952_v30 = vld [vmem:[#allocation7 + $0x278] sm:$0xff] }
 0x288   : > { %2077 = vmatprep.subr.bf16.mxu1 %v2076_v47  ;;  %v3157_v47 = vadd.s32 128, %v3154_v45  ;;  %v2100_v33 = vpack.c.bf16 %v952_v30, %v950_v29  ;;  %v971_v29 = vld [vmem:[#allocation7 + $0x310] sm:$0xff]  ;;  %v974_v30 = vld [vmem:[#allocation7 + $0x328] sm:$0xff] }
 0x289   : > { %2015 = vmatpush1.bf16.msra.mxu0 %v3136_v59 }
 0x28a   : > { %2017 = vmatprep.subr.bf16.mxu0 %v3139_v0  ;;  %v650_v48 = vsel %vm648_vm1, %v3154_v45, %v3157_v47 }
 0x28b   : > { %2079 = vmatpush1.bf16.msra.mxu1 %v2078_v63  ;;  %v944_v63 = vld [vmem:[#allocation7 + $0x238] sm:$0xff] }
 0x28c   : > { %2081 = vmatprep.subr.bf16.mxu1 %v2080_v10  ;;  %v2092_v12 = vpack.c.bf16 %v944_v63, %v942_v58  ;;  %v2730_v10 = vmov 1.0   ;;  %v959_v58 = vld [vmem:[#allocation7 + $0x2b0] sm:$0xff]  ;;  %v962_v63 = vld [vmem:[#allocation7 + $0x2c8] sm:$0xff] }
 0x28d   : > { %2019 = vmatpush1.bf16.msra.mxu0 %v3142_v25 }
 0x28e   : > { %2021 = vmatprep.subr.bf16.mxu0 %v3145_v28 }
 0x28f   : > { %2083 = vmatpush1.bf16.msra.mxu1 %v2082_v27  ;;  %v947_v27 = vld [vmem:[#allocation7 + $0x250] sm:$0xff] }
 0x290   : > { %2085 = vmatprep.subr.bf16.mxu1 %v2084_v32  ;;  %v2098_v32 = vpack.c.bf16 %v947_v27, %v945_v20  ;;  %v969_v27 = vld [vmem:[#allocation7 + $0x300] sm:$0xff] }
 0x291   : > { %2023 = vmatpush1.bf16.msra.mxu0 %v3148_v39 }
 0x292   : > { %2089 = vmatprep.subr.bf16.mxu0 %v2088_v55  ;;  %v958_v55 = vld [vmem:[#allocation7 + $0x2a8] sm:$0xff] }
 0x293   : > { %2087 = vmatpush1.bf16.msra.mxu1 %v2086_v44  ;;  %v951_v44 = vld [vmem:[#allocation7 + $0x270] sm:$0xff] }
 0x294   : > { %2153 = vmatprep.subr.bf16.mxu1 %v3056_v18  ;;  %v937_v18 = vld [vmem:[#allocation7 + $0x200] sm:$0xff] }
 0x295   : > { %v2090_v5 = vpack.c.bf16 %v939_v56, %v937_v18  ;;  %v2106_v18 = vpack.c.bf16 %v955_v53, %v953_v51  ;;  %v957_v56 = vld [vmem:[#allocation7 + $0x2a0] sm:$0xff] }
 0x296   : > { %v981_v53 = vld [vmem:[#allocation7 + $0x360] sm:$0xff] }
 0x2f1   : > { %v652_v46 = vpop.xlane.xlu0 %651 }
 0x2f2   : > { %2501 = vset.pattern.permute.xlu0 %v652_v46  ;;  %v954_v46 = vld [vmem:[#allocation7 + $0x288] sm:$0xff] }
 0x2f6   : > { %654 = vperm.xlu0 %2501, %v650_v48   ;;  %v2102_v48 = vpack.c.bf16 %v951_v44, %v949_v34  ;;  %v975_v34 = vld [vmem:[#allocation7 + $0x330] sm:$0xff]  ;;  %v978_v44 = vld [vmem:[#allocation7 + $0x348] sm:$0xff] }
 0x375   : > { %v3164_v1 = vpop.permute.xlu0 %654 }
 0x376   : > { %vm656_vm2 = vcmp.eq.s32.totalorder %v3154_v45, %v3164_v1  ;;  %vm657_vm3 = vcmp.eq.s32.totalorder %v3157_v47, %v3164_v1 }
 0x377   : > { %1861 = vmatprep.mubr.msk.f32.mxu0 %vm657_vm3, %v2730_v10  ;;  %1863 = vmatprep.mubr.msk.f32.mxu1 %vm657_vm3, %v2730_v10 }
 0x378   : > { %1862 = vmatmul.mubr.msk.f32.vlgmr.msra.gmra.mrb[2].mxu0 %vm656_vm2, %v2730_v10  ;;  %1864 = vmatmul.mubr.msk.f32.vlgmr.msra.gmra.mrb[2].mxu1 %vm656_vm2, %v2730_v10 }
 0x379   : > { %2091 = vmatpush1.bf16.msra.mxu0 %v2090_v5  ;;  %2155 = vmatpush1.bf16.msra.mxu1 %v3058_v23  ;;  %v956_v23 = vld [vmem:[#allocation7 + $0x298] sm:$0xff]  ;;  %v2110_v5 = vpack.c.bf16 %v959_v58, %v957_v56  ;;  %v987_v56 = vld [vmem:[#allocation7 + $0x390] sm:$0xff]  ;;  %v990_v58 = vld [vmem:[#allocation7 + $0x3a8] sm:$0xff] }
 0x37a   : > { %2093 = vmatprep.subr.bf16.mxu0 %v2092_v12  ;;  %2157 = vmatprep.subr.bf16.mxu1 %v3062_v31  ;;  %v2104_v31 = vpack.c.bf16 %v956_v23, %v954_v46  ;;  %v961_v12 = vld [vmem:[#allocation7 + $0x2c0] sm:$0xff] }
 0x37b   : > { %v2114_v11 = vpack.c.bf16 %v963_v13, %v961_v12  ;;  %v977_v23 = vld [vmem:[#allocation7 + $0x340] sm:$0xff] }
 0x37c   : > { %v993_v13 = vld [vmem:[#allocation7 + $0x3c0] sm:$0xff] }
 0x37d   : > { %2095 = vmatpush1.bf16.msra.mxu0 %v2094_v15  ;;  %2159 = vmatpush1.bf16.msra.mxu1 %v3064_v36  ;;  %v960_v36 = vld [vmem:[#allocation7 + $0x2b8] sm:$0xff]  ;;  %v967_v15 = vld [vmem:[#allocation7 + $0x2f0] sm:$0xff] }
 0x37e   : > { %2097 = vmatprep.subr.bf16.mxu0 %v2096_v17  ;;  %2161 = vmatprep.subr.bf16.mxu1 %v3067_v41  ;;  %v2108_v41 = vpack.c.bf16 %v960_v36, %v958_v55  ;;  %v970_v17 = vld [vmem:[#allocation7 + $0x308] sm:$0xff]  ;;  %v2118_v20 = vpack.c.bf16 %v967_v15, %v965_v14  ;;  %v983_v55 = vld [vmem:[#allocation7 + $0x370] sm:$0xff] }
 0x37f   : > { %v986_v36 = vld [vmem:[#allocation7 + $0x388] sm:$0xff]  ;;  %v1865_v15 = vld [vmem:[%s3340_s4 + $0x2] sm:$0x3] }
 0x381   : > { %2099 = vmatpush1.bf16.msra.mxu0 %v2098_v32  ;;  %2163 = vmatpush1.bf16.msra.mxu1 %v3070_v49  ;;  %v964_v49 = vld [vmem:[#allocation7 + $0x2d8] sm:$0xff]  ;;  %v2122_v32 = vpack.c.bf16 %v971_v29, %v969_v27 }
 0x382   : > { %2101 = vmatprep.subr.bf16.mxu0 %v2100_v33  ;;  %2165 = vmatprep.subr.bf16.mxu1 %v3073_v54  ;;  %v2112_v54 = vpack.c.bf16 %v964_v49, %v962_v63  ;;  %v973_v33 = vld [vmem:[#allocation7 + $0x320] sm:$0xff] }
 0x383   : > { %v2126_v46 = vpack.c.bf16 %v975_v34, %v973_v33  ;;  %v989_v49 = vld [vmem:[#allocation7 + $0x3a0] sm:$0xff]  ;;  %v1243_v34 = vld [vmem:[#allocation8 + $0x210] sm:$0xff] }
 0x385   : > { %2103 = vmatpush1.bf16.msra.mxu0 %v2102_v48  ;;  %2167 = vmatpush1.bf16.msra.mxu1 %v3076_v6  ;;  %v968_v6 = vld [vmem:[#allocation7 + $0x2f8] sm:$0xff]  ;;  %v979_v48 = vld [vmem:[#allocation7 + $0x350] sm:$0xff] }
 0x386   : > { %2105 = vmatprep.subr.bf16.mxu0 %v2104_v31  ;;  %2169 = vmatprep.subr.bf16.mxu1 %v3079_v8  ;;  %v2116_v8 = vpack.c.bf16 %v968_v6, %v966_v9  ;;  %v982_v31 = vld [vmem:[#allocation7 + $0x368] sm:$0xff]  ;;  %v2130_v51 = vpack.c.bf16 %v979_v48, %v977_v23  ;;  %v995_v9 = vld [vmem:[#allocation7 + $0x3d0] sm:$0xff]  ;;  %v1245_v23 = vld [vmem:[#allocation8 + $0x220] sm:$0xff] }
 0x387   : > { %v1247_v48 = vld [vmem:[#allocation8 + $0x230] sm:$0xff] }
 0x389   : > { %2107 = vmatpush1.bf16.msra.mxu0 %v2106_v18  ;;  %2171 = vmatpush1.bf16.msra.mxu1 %v3082_v21  ;;  %v972_v21 = vld [vmem:[#allocation7 + $0x318] sm:$0xff]  ;;  %v2134_v18 = vpack.c.bf16 %v983_v55, %v981_v53  ;;  %v1249_v53 = vld [vmem:[#allocation8 + $0x240] sm:$0xff]  ;;  %v1251_v55 = vld [vmem:[#allocation8 + $0x250] sm:$0xff] }
 0x38a   : > { %2109 = vmatprep.subr.bf16.mxu0 %v2108_v41  ;;  %2173 = vmatprep.subr.bf16.mxu1 %v3085_v24  ;;  %v2120_v24 = vpack.c.bf16 %v972_v21, %v970_v17  ;;  %v985_v41 = vld [vmem:[#allocation7 + $0x380] sm:$0xff]  ;;  %v1080_v17 = vrot.slane %v1865_v15, %v3030_v62 }
 0x38b   : > { %v2138_v63 = vpack.c.bf16 %v987_v56, %v985_v41  ;;  %v1253_v41 = vld [vmem:[#allocation8 + $0x260] sm:$0xff]  ;;  %v1255_v56 = vld [vmem:[#allocation8 + $0x270] sm:$0xff] }
 0x38d   : > { %2111 = vmatpush1.bf16.msra.mxu0 %v2110_v5  ;;  %2175 = vmatpush1.bf16.msra.mxu1 %v3088_v35  ;;  %v976_v35 = vld [vmem:[#allocation7 + $0x338] sm:$0xff]  ;;  %v991_v5 = vld [vmem:[#allocation7 + $0x3b0] sm:$0xff] }
 0x38e   : > { %2113 = vmatprep.subr.bf16.mxu0 %v2112_v54  ;;  %2177 = vmatprep.subr.bf16.mxu1 %v3091_v38  ;;  %v2124_v38 = vpack.c.bf16 %v976_v35, %v974_v30  ;;  %v994_v54 = vld [vmem:[#allocation7 + $0x3c8] sm:$0xff]  ;;  %v2142_v12 = vpack.c.bf16 %v991_v5, %v989_v49  ;;  %v1257_v49 = vld [vmem:[#allocation8 + $0x280] sm:$0xff]  ;;  %v1259_v5 = vld [vmem:[#allocation8 + $0x290] sm:$0xff] }
 0x38f   : > { %v1242_v35 = vld [vmem:[#allocation8 + $0x208] sm:$0xff] }
 0x391   : > { %2115 = vmatpush1.bf16.msra.mxu0 %v2114_v11  ;;  %2179 = vmatpush1.bf16.msra.mxu1 %v3094_v50  ;;  %v980_v50 = vld [vmem:[#allocation7 + $0x358] sm:$0xff]  ;;  %v997_v11 = vld [vmem:[#allocation7 + $0x3e0] sm:$0xff] }
 0x392   : > { %2117 = vmatprep.subr.bf16.mxu0 %v2116_v8  ;;  %2181 = vmatprep.subr.bf16.mxu1 %v3097_v52  ;;  %v2128_v52 = vpack.c.bf16 %v980_v50, %v978_v44  ;;  %v1246_v44 = vld [vmem:[#allocation8 + $0x228] sm:$0xff]  ;;  %v1248_v50 = vld [vmem:[#allocation8 + $0x238] sm:$0xff] }
 0x395   : > { %2119 = vmatpush1.bf16.msra.mxu0 %v2118_v20  ;;  %2183 = vmatpush1.bf16.msra.mxu1 %v3100_v2  ;;  %v984_v2 = vld [vmem:[#allocation7 + $0x378] sm:$0xff]  ;;  %v1084_v20 = vrot.slane %v1865_v15, %v3025_v60  ;;  %v1271_v15 = vld [vmem:[#allocation8 + $0x2f0] sm:$0xff] }
 0x396   : > { %2121 = vmatprep.subr.bf16.mxu0 %v2120_v24  ;;  %2185 = vmatprep.subr.bf16.mxu1 %v3103_v7  ;;  %v2132_v7 = vpack.c.bf16 %v984_v2, %v982_v31  ;;  %v1250_v31 = vld [vmem:[#allocation8 + $0x248] sm:$0xff]  ;;  %v1252_v2 = vld [vmem:[#allocation8 + $0x258] sm:$0xff] }
 0x399   : > { %2123 = vmatpush1.bf16.msra.mxu0 %v2122_v32  ;;  %2187 = vmatpush1.bf16.msra.mxu1 %v3106_v22  ;;  %v988_v22 = vld [vmem:[#allocation7 + $0x398] sm:$0xff] }
 0x39a   : > { %2125 = vmatprep.subr.bf16.mxu0 %v2124_v38  ;;  %2189 = vmatprep.subr.bf16.mxu1 %v3109_v26  ;;  %v2136_v26 = vpack.c.bf16 %v988_v22, %v986_v36  ;;  %v1244_v32 = vld [vmem:[#allocation8 + $0x218] sm:$0xff]  ;;  %v1241_v38 = vld [vmem:[#allocation8 + $0x200] sm:$0xff]  ;;  %v1254_v36 = vld [vmem:[#allocation8 + $0x268] sm:$0xff] }
 0x39b   : > { %v2216_v33 = vpack.c.bf16 %v1244_v32, %v1242_v35  ;;  %v1256_v22 = vld [vmem:[#allocation8 + $0x278] sm:$0xff] }
 0x39c   : > { %v1280_v35 = vld [vmem:[#allocation8 + $0x338] sm:$0xff] }
 0x39d   : > { %2127 = vmatpush1.bf16.msra.mxu0 %v2126_v46  ;;  %2191 = vmatpush1.bf16.msra.mxu1 %v3112_v40  ;;  %v992_v40 = vld [vmem:[#allocation7 + $0x3b8] sm:$0xff]  ;;  %v2218_v46 = vpack.c.bf16 %v1243_v34, %v1241_v38  ;;  %v1279_v34 = vld [vmem:[#allocation8 + $0x330] sm:$0xff] }
 0x39e   : > { %2129 = vmatprep.subr.bf16.mxu0 %v2128_v52  ;;  %2193 = vmatprep.subr.bf16.mxu1 %v3115_v43  ;;  %v2140_v43 = vpack.c.bf16 %v992_v40, %v990_v58  ;;  %v2220_v52 = vpack.c.bf16 %v1248_v50, %v1246_v44  ;;  %v1258_v58 = vld [vmem:[#allocation8 + $0x288] sm:$0xff]  ;;  %v1260_v40 = vld [vmem:[#allocation8 + $0x298] sm:$0xff] }
 0x39f   : > { %v1282_v44 = vld [vmem:[#allocation8 + $0x348] sm:$0xff]  ;;  %v1284_v50 = vld [vmem:[#allocation8 + $0x358] sm:$0xff] }
 0x3a1   : > { %2131 = vmatpush1.bf16.msra.mxu0 %v2130_v51  ;;  %2195 = vmatpush1.bf16.msra.mxu1 %v3118_v57  ;;  %v996_v57 = vld [vmem:[#allocation7 + $0x3d8] sm:$0xff]  ;;  %v2222_v51 = vpack.c.bf16 %v1247_v48, %v1245_v23  ;;  %v1281_v23 = vld [vmem:[#allocation8 + $0x340] sm:$0xff]  ;;  %v1283_v48 = vld [vmem:[#allocation8 + $0x350] sm:$0xff] }
 0x3a2   : > { %2133 = vmatprep.subr.bf16.mxu0 %v2132_v7  ;;  %2197 = vmatprep.subr.bf16.mxu1 %v3121_v61  ;;  %v2144_v61 = vpack.c.bf16 %v996_v57, %v994_v54  ;;  %v2224_v7 = vpack.c.bf16 %v1252_v2, %v1250_v31  ;;  %v1262_v54 = vld [vmem:[#allocation8 + $0x2a8] sm:$0xff]  ;;  %v1264_v57 = vld [vmem:[#allocation8 + $0x2b8] sm:$0xff] }
 0x3a3   : > { %v1286_v31 = vld [vmem:[#allocation8 + $0x368] sm:$0xff]  ;;  %v1288_v2 = vld [vmem:[#allocation8 + $0x378] sm:$0xff] }
 0x3a5   : > { %2135 = vmatpush1.bf16.msra.mxu0 %v2134_v18  ;;  %2199 = vmatpush1.bf16.msra.mxu1 %v3124_v16  ;;  %v2146_v16 = vpack.c.bf16 %v995_v9, %v993_v13  ;;  %v2226_v18 = vpack.c.bf16 %v1251_v55, %v1249_v53  ;;  %v1261_v13 = vld [vmem:[#allocation8 + $0x2a0] sm:$0xff]  ;;  %v1263_v9 = vld [vmem:[#allocation8 + $0x2b0] sm:$0xff] }
 0x3a6   : > { %2137 = vmatprep.subr.bf16.mxu0 %v2136_v26  ;;  %2201 = vmatprep.subr.bf16.mxu1 %v3127_v19  ;;  %v998_v19 = vld [vmem:[#allocation7 + $0x3e8] sm:$0xff]  ;;  %v2228_v26 = vpack.c.bf16 %v1256_v22, %v1254_v36  ;;  %v1285_v53 = vld [vmem:[#allocation8 + $0x360] sm:$0xff]  ;;  %v1287_v55 = vld [vmem:[#allocation8 + $0x370] sm:$0xff] }
 0x3a7   : > { %v1290_v36 = vld [vmem:[#allocation8 + $0x388] sm:$0xff]  ;;  %v1292_v22 = vld [vmem:[#allocation8 + $0x398] sm:$0xff] }
 0x3a9   : > { %2139 = vmatpush1.bf16.msra.mxu0 %v2138_v63  ;;  %2203 = vmatpush1.bf16.msra.mxu1 %v3130_v37  ;;  %v1000_v37 = vld [vmem:[#allocation7 + $0x3f8] sm:$0xff]  ;;  %v2230_v63 = vpack.c.bf16 %v1255_v56, %v1253_v41  ;;  %v1289_v41 = vld [vmem:[#allocation8 + $0x380] sm:$0xff]  ;;  %v1291_v56 = vld [vmem:[#allocation8 + $0x390] sm:$0xff] }
 0x3aa   : > { %2141 = vmatprep.subr.bf16.mxu0 %v2140_v43  ;;  %2205 = vmatprep.subr.bf16.mxu1 %v3133_v42  ;;  %v2148_v6 = vpack.c.bf16 %v1000_v37, %v998_v19  ;;  %v999_v42 = vld [vmem:[#allocation7 + $0x3f0] sm:$0xff]  ;;  %v2232_v43 = vpack.c.bf16 %v1260_v40, %v1258_v58  ;;  %v1268_v19 = vld [vmem:[#allocation8 + $0x2d8] sm:$0xff]  ;;  %v2238_v37 = vpack.c.bf16 %v1263_v9, %v1261_v13  ;;  %v1294_v58 = vld [vmem:[#allocation8 + $0x3a8] sm:$0xff] }
 0x3ab   : > { %v2150_v8 = vpack.c.bf16 %v999_v42, %v997_v11  ;;  %v1265_v11 = vld [vmem:[#allocation8 + $0x2c0] sm:$0xff]  ;;  %v1267_v42 = vld [vmem:[#allocation8 + $0x2d0] sm:$0xff]  ;;  %v1296_v40 = vld [vmem:[#allocation8 + $0x3b8] sm:$0xff] }
 0x3ac   : > { %v1297_v13 = vld [vmem:[#allocation8 + $0x3c0] sm:$0xff]  ;;  %v1299_v9 = vld [vmem:[#allocation8 + $0x3d0] sm:$0xff] }
 0x3ad   : > { %2143 = vmatpush1.bf16.msra.mxu0 %v2142_v12  ;;  %2207 = vmatpush1.bf16.msra.mxu1 %v3136_v59  ;;  %v2234_v12 = vpack.c.bf16 %v1259_v5, %v1257_v49  ;;  %v1293_v49 = vld [vmem:[#allocation8 + $0x3a0] sm:$0xff]  ;;  %v1295_v5 = vld [vmem:[#allocation8 + $0x3b0] sm:$0xff] }
 0x3ae   : > { %2145 = vmatprep.subr.bf16.mxu0 %v2144_v61  ;;  %2209 = vmatprep.subr.bf16.mxu1 %v3139_v0  ;;  %v2236_v61 = vpack.c.bf16 %v1264_v57, %v1262_v54  ;;  %v1298_v54 = vld [vmem:[#allocation8 + $0x3c8] sm:$0xff]  ;;  %v1300_v57 = vld [vmem:[#allocation8 + $0x3d8] sm:$0xff] }
 0x3b1   : > { %2147 = vmatpush1.bf16.msra.mxu0 %v2146_v16  ;;  %2211 = vmatpush1.bf16.msra.mxu1 %v3142_v25  ;;  %v1266_v16 = vld [vmem:[#allocation8 + $0x2c8] sm:$0xff] }
 0x3b2   : > { %2213 = vmatprep.subr.bf16.mxu1 %v3145_v28  ;;  %2149 = vmatprep.subr.bf16.mxu0 %v2148_v6  ;;  %v2240_v6 = vpack.c.bf16 %v1268_v19, %v1266_v16  ;;  %v1302_v16 = vld [vmem:[#allocation8 + $0x3e8] sm:$0xff]  ;;  %v1304_v19 = vld [vmem:[#allocation8 + $0x3f8] sm:$0xff] }
 0x3b5   : > { %2215 = vmatpush1.bf16.msra.mxu1 %v3148_v39  ;;  %2151 = vmatpush1.bf16.msra.mxu0 %v2150_v8  ;;  %v1270_v8 = vld [vmem:[#allocation8 + $0x2e8] sm:$0xff] }
 0x3b6   : > { %2217 = vmatprep.subr.bf16.mxu0 %v2216_v33  ;;  %v1277_v33 = vld [vmem:[#allocation8 + $0x320] sm:$0xff] }
 0x44b   : > { %v792_v59 = vpop.f32.mrb[2].mxu0  ;;  %v929_v14 = vpop.f32.mrb[2].mxu1 }
 0x44c   : > { %797 = vst [vmem:[%s3206_s20] sm:$0xff] %v792_v59  ;;  %v794_v0 = vpop.f32.mrb[3].mxu0  ;;  %v931_v25 = vpop.f32.mrb[3].mxu1  ;;  %v3214_v39 = vsub.f32 %v3036_v4, %v929_v14  ;;  %v1272_v59 = vld [vmem:[#allocation8 + $0x2f8] sm:$0xff]  ;;  %v2242_v14 = vpack.c.bf16 %v1267_v42, %v1265_v11  ;;  %v1301_v11 = vld [vmem:[#allocation8 + $0x3e0] sm:$0xff]  ;;  %v1303_v42 = vld [vmem:[#allocation8 + $0x3f0] sm:$0xff] }
 0x44d   : > { %798 = vst [vmem:[%s3206_s20 + $0x8] sm:$0xff] %v794_v0  ;;  %v3211_v28 = vsub.f32 %v3034_v3, %v931_v25  ;;  %v2244_v0 = vpack.c.bf16 %v1272_v59, %v1270_v8  ;;  %v1269_v25 = vld [vmem:[#allocation8 + $0x2e0] sm:$0xff]  ;;  %v2278_v8 = vpack.c.bf16 %v1303_v42, %v1301_v11 }
 0x44e   : > { %v1411_v42 = vld [vmem:[#allocation7 + $0x500] sm:$0xff] }
 0x44f   : > { %1065 = vmatprep.mubr.f32.mxu0 %v3211_v28 }
 0x450   : > { %1066 = vmatmul.mubr.f32.vlgmr.msra.gmra.mrb[4].mxu0 %v3214_v39 }
 0x451   : > { %2219 = vmatpush1.bf16.msra.mxu0 %v2218_v46  ;;  %v2254_v46 = vpack.c.bf16 %v1279_v34, %v1277_v33  ;;  %v1387_v34 = vld [vmem:[#allocation7 + $0x440] sm:$0xff] }
 0x452   : > { %2221 = vmatprep.subr.bf16.mxu0 %v2220_v52  ;;  %v2256_v52 = vpack.c.bf16 %v1284_v50, %v1282_v44  ;;  %v1389_v44 = vld [vmem:[#allocation7 + $0x450] sm:$0xff]  ;;  %v1392_v50 = vld [vmem:[#allocation7 + $0x468] sm:$0xff] }
 0x455   : > { %2223 = vmatpush1.bf16.msra.mxu0 %v2222_v51  ;;  %v2258_v51 = vpack.c.bf16 %v1283_v48, %v1281_v23  ;;  %v1391_v48 = vld [vmem:[#allocation7 + $0x460] sm:$0xff] }
 0x456   : > { %2225 = vmatprep.subr.bf16.mxu0 %v2224_v7  ;;  %v2260_v7 = vpack.c.bf16 %v1288_v2, %v1286_v31  ;;  %v1393_v31 = vld [vmem:[#allocation7 + $0x470] sm:$0xff]  ;;  %v1396_v2 = vld [vmem:[#allocation7 + $0x488] sm:$0xff] }
 0x459   : > { %2227 = vmatpush1.bf16.msra.mxu0 %v2226_v18  ;;  %v2262_v18 = vpack.c.bf16 %v1287_v55, %v1285_v53  ;;  %v1395_v55 = vld [vmem:[#allocation7 + $0x480] sm:$0xff] }
 0x45a   : > { %2229 = vmatprep.subr.bf16.mxu0 %v2228_v26  ;;  %v2264_v26 = vpack.c.bf16 %v1292_v22, %v1290_v36  ;;  %v1397_v36 = vld [vmem:[#allocation7 + $0x490] sm:$0xff]  ;;  %v1400_v22 = vld [vmem:[#allocation7 + $0x4a8] sm:$0xff] }
 0x45d   : > { %2231 = vmatpush1.bf16.msra.mxu0 %v2230_v63  ;;  %v2266_v63 = vpack.c.bf16 %v1291_v56, %v1289_v41  ;;  %v1399_v56 = vld [vmem:[#allocation7 + $0x4a0] sm:$0xff] }
 0x45e   : > { %2233 = vmatprep.subr.bf16.mxu0 %v2232_v43  ;;  %v2268_v43 = vpack.c.bf16 %v1296_v40, %v1294_v58  ;;  %v1401_v58 = vld [vmem:[#allocation7 + $0x4b0] sm:$0xff]  ;;  %v1404_v40 = vld [vmem:[#allocation7 + $0x4c8] sm:$0xff] }
 0x461   : > { %2235 = vmatpush1.bf16.msra.mxu0 %v2234_v12  ;;  %v2270_v12 = vpack.c.bf16 %v1295_v5, %v1293_v49  ;;  %v1403_v5 = vld [vmem:[#allocation7 + $0x4c0] sm:$0xff] }
 0x462   : > { %2237 = vmatprep.subr.bf16.mxu0 %v2236_v61  ;;  %v2272_v61 = vpack.c.bf16 %v1300_v57, %v1298_v54  ;;  %v1405_v54 = vld [vmem:[#allocation7 + $0x4d0] sm:$0xff]  ;;  %v1408_v57 = vld [vmem:[#allocation7 + $0x4e8] sm:$0xff] }
 0x465   : > { %2239 = vmatpush1.bf16.msra.mxu0 %v2238_v37  ;;  %v2274_v37 = vpack.c.bf16 %v1299_v9, %v1297_v13  ;;  %v1407_v9 = vld [vmem:[#allocation7 + $0x4e0] sm:$0xff] }
 0x466   : > { %2241 = vmatprep.subr.bf16.mxu0 %v2240_v6  ;;  %v2276_v6 = vpack.c.bf16 %v1304_v19, %v1302_v16  ;;  %v1409_v16 = vld [vmem:[#allocation7 + $0x4f0] sm:$0xff]  ;;  %v1412_v19 = vld [vmem:[#allocation7 + $0x508] sm:$0xff] }
 0x469   : > { %2243 = vmatpush1.bf16.msra.mxu0 %v2242_v14 }
 0x46a   : > { %2245 = vmatprep.subr.bf16.mxu0 %v2244_v0  ;;  %v1380_v0 = vld [vmem:[#allocation7 + $0x408] sm:$0xff] }
 0x523   : > { %v1067_v21 = vpop.f32.mrb[4].mxu0 }
 0x524   : > { %v1074_v24 = vmul.f32 2.0, %v1067_v21  ;;  %v1069_v27 = vpop.f32.mrb[5].mxu0  ;;  %v1276_v21 = vld [vmem:[#allocation8 + $0x318] sm:$0xff] }
 0x525   : > { %v1075_v3 = vmul.f32 2.0, %v1069_v27  ;;  %v1273_v27 = vld [vmem:[#allocation8 + $0x300] sm:$0xff] }
 0x526   : > { %v3223_v29 = vsub.f32 %v1080_v17, %v1074_v24  ;;  %v1274_v17 = vld [vmem:[#allocation8 + $0x308] sm:$0xff] }
 0x527   : > { %v3225_v4 = vsub.f32 %v1084_v20, %v1075_v3  ;;  %v2246_v20 = vpack.c.bf16 %v1271_v15, %v1269_v25  ;;  %v2248_v24 = vpack.c.bf16 %v1276_v21, %v1274_v17  ;;  %v1275_v3 = vld [vmem:[#allocation8 + $0x310] sm:$0xff]  ;;  %v1382_v25 = vld [vmem:[#allocation7 + $0x418] sm:$0xff]  ;;  %v1379_v17 = vld [vmem:[#allocation7 + $0x400] sm:$0xff] }
 0x528   : > { %v2250_v32 = vpack.c.bf16 %v1275_v3, %v1273_v27  ;;  %v2280_v15 = vpack.c.bf16 %v1382_v25, %v1380_v0  ;;  %v1381_v21 = vld [vmem:[#allocation7 + $0x410] sm:$0xff] }
 0x529   : > { %vm1089_vm4 = vcmp.le.f32.partialorder %v3223_v29, %v3225_v4  ;;  %2247 = vmatpush1.bf16.msra.mxu0 %v2246_v20  ;;  %v1384_v20 = vld [vmem:[#allocation7 + $0x428] sm:$0xff]  ;;  %v2282_v3 = vpack.c.bf16 %v1381_v21, %v1379_v17  ;;  %v1417_v17 = vld [vmem:[#allocation7 + $0x530] sm:$0xff] }
 0x52a   : > { %v1090_v30 = vsel %vm1089_vm4, %v3223_v29, %v3225_v4  ;;  %2249 = vmatprep.subr.bf16.mxu0 %v2248_v24  ;;  %v1091_v14 = vsel %vm1089_vm4, %v3154_v45, %v3157_v47  ;;  %2281 = vmatprep.subr.bf16.mxu1 %v2280_v15  ;;  %v1386_v24 = vld [vmem:[#allocation7 + $0x438] sm:$0xff]  ;;  %v1383_v4 = vld [vmem:[#allocation7 + $0x420] sm:$0xff]  ;;  %v1420_v21 = vld [vmem:[#allocation7 + $0x548] sm:$0xff] }
 0x52b   : > { %1092 = vmin.index.xlane.f32.xlu1 %v1090_v30  ;;  %v1278_v30 = vld [vmem:[#allocation8 + $0x328] sm:$0xff]  ;;  %v2284_v29 = vpack.c.bf16 %v1386_v24, %v1384_v20  ;;  %v1415_v15 = vld [vmem:[#allocation7 + $0x520] sm:$0xff]  ;;  %v1422_v20 = vld [vmem:[#allocation7 + $0x558] sm:$0xff] }
 0x52c   : > { %v2252_v38 = vpack.c.bf16 %v1280_v35, %v1278_v30  ;;  %v1385_v30 = vld [vmem:[#allocation7 + $0x430] sm:$0xff]  ;;  %v1388_v35 = vld [vmem:[#allocation7 + $0x448] sm:$0xff]  ;;  %v2318_v24 = vpack.c.bf16 %v1417_v17, %v1415_v15 }
 0x52d   : > { %2251 = vmatpush1.bf16.msra.mxu0 %v2250_v32  ;;  %v1390_v32 = vld [vmem:[#allocation7 + $0x458] sm:$0xff]  ;;  %v1547_v15 = vld [vmem:[#allocation10 + $0x10] sm:$0xff]  ;;  %v1550_v17 = vld [vmem:[#allocation10 + $0x28] sm:$0xff] }
 0x52e   : > { %2253 = vmatprep.subr.bf16.mxu0 %v2252_v38  ;;  %v2286_v38 = vpack.c.bf16 %v1385_v30, %v1383_v4  ;;  %v2288_v33 = vpack.c.bf16 %v1390_v32, %v1388_v35  ;;  %v1421_v4 = vld [vmem:[#allocation7 + $0x550] sm:$0xff]  ;;  %v1424_v30 = vld [vmem:[#allocation7 + $0x568] sm:$0xff]  ;;  %v1426_v35 = vld [vmem:[#allocation7 + $0x578] sm:$0xff] }
 0x531   : > { %2255 = vmatpush1.bf16.msra.mxu0 %v2254_v46  ;;  %v1394_v46 = vld [vmem:[#allocation7 + $0x478] sm:$0xff] }
 0x532   : > { %2257 = vmatprep.subr.bf16.mxu0 %v2256_v52  ;;  %v2290_v52 = vpack.c.bf16 %v1389_v44, %v1387_v34  ;;  %v2292_v23 = vpack.c.bf16 %v1394_v46, %v1392_v50  ;;  %v1425_v34 = vld [vmem:[#allocation7 + $0x570] sm:$0xff]  ;;  %v1428_v44 = vld [vmem:[#allocation7 + $0x588] sm:$0xff]  ;;  %v1430_v50 = vld [vmem:[#allocation7 + $0x598] sm:$0xff] }
 0x535   : > { %2259 = vmatpush1.bf16.msra.mxu0 %v2258_v51  ;;  %v1398_v51 = vld [vmem:[#allocation7 + $0x498] sm:$0xff] }
 0x536   : > { %2261 = vmatprep.subr.bf16.mxu0 %v2260_v7  ;;  %v2294_v7 = vpack.c.bf16 %v1393_v31, %v1391_v48  ;;  %v2296_v53 = vpack.c.bf16 %v1398_v51, %v1396_v2  ;;  %v1429_v48 = vld [vmem:[#allocation7 + $0x590] sm:$0xff]  ;;  %v1432_v31 = vld [vmem:[#allocation7 + $0x5a8] sm:$0xff]  ;;  %v1434_v2 = vld [vmem:[#allocation7 + $0x5b8] sm:$0xff] }
 0x539   : > { %2263 = vmatpush1.bf16.msra.mxu0 %v2262_v18  ;;  %v1402_v18 = vld [vmem:[#allocation7 + $0x4b8] sm:$0xff] }
 0x53a   : > { %2265 = vmatprep.subr.bf16.mxu0 %v2264_v26  ;;  %v2298_v26 = vpack.c.bf16 %v1397_v36, %v1395_v55  ;;  %v2300_v41 = vpack.c.bf16 %v1402_v18, %v1400_v22  ;;  %v1433_v55 = vld [vmem:[#allocation7 + $0x5b0] sm:$0xff]  ;;  %v1436_v36 = vld [vmem:[#allocation7 + $0x5c8] sm:$0xff]  ;;  %v1438_v22 = vld [vmem:[#allocation7 + $0x5d8] sm:$0xff] }
 0x53d   : > { %2267 = vmatpush1.bf16.msra.mxu0 %v2266_v63  ;;  %v1406_v63 = vld [vmem:[#allocation7 + $0x4d8] sm:$0xff] }
 0x53e   : > { %2269 = vmatprep.subr.bf16.mxu0 %v2268_v43  ;;  %v2302_v43 = vpack.c.bf16 %v1401_v58, %v1399_v56  ;;  %v2304_v49 = vpack.c.bf16 %v1406_v63, %v1404_v40  ;;  %v1437_v56 = vld [vmem:[#allocation7 + $0x5d0] sm:$0xff]  ;;  %v1440_v40 = vld [vmem:[#allocation7 + $0x5e8] sm:$0xff]  ;;  %v1442_v63 = vld [vmem:[#allocation7 + $0x5f8] sm:$0xff] }
 0x541   : > { %2271 = vmatpush1.bf16.msra.mxu0 %v2270_v12  ;;  %v1410_v12 = vld [vmem:[#allocation7 + $0x4f8] sm:$0xff] }
 0x542   : > { %2273 = vmatprep.subr.bf16.mxu0 %v2272_v61  ;;  %v2306_v61 = vpack.c.bf16 %v1405_v54, %v1403_v5  ;;  %v2308_v13 = vpack.c.bf16 %v1410_v12, %v1408_v57  ;;  %v1441_v5 = vld [vmem:[#allocation7 + $0x5f0] sm:$0xff] }
 0x545   : > { %2275 = vmatpush1.bf16.msra.mxu0 %v2274_v37  ;;  %v1414_v37 = vld [vmem:[#allocation7 + $0x518] sm:$0xff] }
 0x546   : > { %2277 = vmatprep.subr.bf16.mxu0 %v2276_v6  ;;  %v2310_v6 = vpack.c.bf16 %v1409_v16, %v1407_v9  ;;  %v2312_v11 = vpack.c.bf16 %v1414_v37, %v1412_v19  ;;  %v1872_v19 = vld [vmem:[%s3340_s4 + $0x4] sm:$0x3] }
 0x547   : > { %v1522_v37 = vrot.slane %v1872_v19, %v3030_v62  ;;  %v1546_v62 = vld [vmem:[#allocation10 + $0x8] sm:$0xff] }
 0x549   : > { %2279 = vmatpush1.bf16.msra.mxu0 %v2278_v8  ;;  %v1413_v8 = vld [vmem:[#allocation7 + $0x510] sm:$0xff] }
 0x54a   : > { %v2314_v0 = vpack.c.bf16 %v1413_v8, %v1411_v42 }
 0x5b8   : > { %v1093_v59 = vpop.xlane.xlu1 %1092 }
 0x5b9   : > { %2502 = vset.pattern.permute.xlu1 %v1093_v59  ;;  %v1416_v59 = vld [vmem:[#allocation7 + $0x528] sm:$0xff] }
 0x5bd   : > { %1095 = vperm.xlu1 %2502, %v1091_v14   ;;  %v1418_v14 = vld [vmem:[#allocation7 + $0x538] sm:$0xff] }
 0x5be   : > { %v2316_v25 = vpack.c.bf16 %v1418_v14, %v1416_v59 }
 0x63c   : > { %v3239_v27 = vpop.permute.xlu1 %1095 }
 0x63d   : > { %vm1097_vm5 = vcmp.eq.s32.totalorder %v3154_v45, %v3239_v27  ;;  %vm1098_vm6 = vcmp.eq.s32.totalorder %v3157_v47, %v3239_v27 }
 0x63e   : > { %1868 = vmatprep.mubr.msk.f32.mxu1 %vm1098_vm6, %v2730_v10  ;;  %1870 = vmatprep.mubr.msk.f32.mxu0 %vm1098_vm6, %v2730_v10 }
 0x63f   : > { %1869 = vmatmul.mubr.msk.f32.vlgmr.msra.gmra.mrb[4].mxu1 %vm1097_vm5, %v2730_v10  ;;  %1871 = vmatmul.mubr.msk.f32.vlgmr.msra.gmra.mrb[6].mxu0 %vm1097_vm5, %v2730_v10 }
 0x640   : > { %2283 = vmatpush1.bf16.msra.mxu1 %v2282_v3  ;;  %v2320_v3 = vpack.c.bf16 %v1422_v20, %v1420_v21  ;;  %v1552_v21 = vld [vmem:[#allocation10 + $0x38] sm:$0xff] }
 0x641   : > { %2285 = vmatprep.subr.bf16.mxu1 %v2284_v29  ;;  %v1419_v29 = vld [vmem:[#allocation7 + $0x540] sm:$0xff] }
 0x642   : > { %v2322_v32 = vpack.c.bf16 %v1421_v4, %v1419_v29  ;;  %v1551_v29 = vld [vmem:[#allocation10 + $0x30] sm:$0xff]  ;;  %v1554_v4 = vld [vmem:[#allocation10 + $0x48] sm:$0xff] }
 0x644   : > { %2287 = vmatpush1.bf16.msra.mxu1 %v2286_v38  ;;  %v2324_v38 = vpack.c.bf16 %v1426_v35, %v1424_v30  ;;  %v1556_v30 = vld [vmem:[#allocation10 + $0x58] sm:$0xff] }
 0x645   : > { %2289 = vmatprep.subr.bf16.mxu1 %v2288_v33  ;;  %v1423_v33 = vld [vmem:[#allocation7 + $0x560] sm:$0xff] }
 0x646   : > { %v2326_v46 = vpack.c.bf16 %v1425_v34, %v1423_v33  ;;  %v1555_v33 = vld [vmem:[#allocation10 + $0x50] sm:$0xff]  ;;  %v1558_v34 = vld [vmem:[#allocation10 + $0x68] sm:$0xff] }
 0x648   : > { %2291 = vmatpush1.bf16.msra.mxu1 %v2290_v52  ;;  %v2328_v52 = vpack.c.bf16 %v1430_v50, %v1428_v44  ;;  %v1560_v44 = vld [vmem:[#allocation10 + $0x78] sm:$0xff] }
 0x649   : > { %2293 = vmatprep.subr.bf16.mxu1 %v2292_v23  ;;  %v1427_v23 = vld [vmem:[#allocation7 + $0x580] sm:$0xff] }
 0x64a   : > { %v2330_v51 = vpack.c.bf16 %v1429_v48, %v1427_v23  ;;  %v1559_v23 = vld [vmem:[#allocation10 + $0x70] sm:$0xff]  ;;  %v1562_v48 = vld [vmem:[#allocation10 + $0x88] sm:$0xff] }
 0x64c   : > { %2295 = vmatpush1.bf16.msra.mxu1 %v2294_v7  ;;  %v2332_v7 = vpack.c.bf16 %v1434_v2, %v1432_v31  ;;  %v1564_v31 = vld [vmem:[#allocation10 + $0x98] sm:$0xff] }
 0x64d   : > { %2297 = vmatprep.subr.bf16.mxu1 %v2296_v53  ;;  %v1431_v53 = vld [vmem:[#allocation7 + $0x5a0] sm:$0xff] }
 0x64e   : > { %v2334_v18 = vpack.c.bf16 %v1433_v55, %v1431_v53  ;;  %v1563_v53 = vld [vmem:[#allocation10 + $0x90] sm:$0xff]  ;;  %v1566_v55 = vld [vmem:[#allocation10 + $0xa8] sm:$0xff] }
 0x650   : > { %2299 = vmatpush1.bf16.msra.mxu1 %v2298_v26  ;;  %v2336_v26 = vpack.c.bf16 %v1438_v22, %v1436_v36  ;;  %v1568_v36 = vld [vmem:[#allocation10 + $0xb8] sm:$0xff] }
 0x651   : > { %2301 = vmatprep.subr.bf16.mxu1 %v2300_v41  ;;  %v1435_v41 = vld [vmem:[#allocation7 + $0x5c0] sm:$0xff] }
 0x652   : > { %v2338_v58 = vpack.c.bf16 %v1437_v56, %v1435_v41  ;;  %v1567_v41 = vld [vmem:[#allocation10 + $0xb0] sm:$0xff]  ;;  %v1570_v56 = vld [vmem:[#allocation10 + $0xc8] sm:$0xff] }
 0x654   : > { %2303 = vmatpush1.bf16.msra.mxu1 %v2302_v43  ;;  %v2340_v43 = vpack.c.bf16 %v1442_v63, %v1440_v40 }
 0x655   : > { %2305 = vmatprep.subr.bf16.mxu1 %v2304_v49  ;;  %v1439_v49 = vld [vmem:[#allocation7 + $0x5e0] sm:$0xff] }
 0x656   : > { %v2342_v54 = vpack.c.bf16 %v1441_v5, %v1439_v49  ;;  %v1571_v49 = vld [vmem:[#allocation10 + $0xd0] sm:$0xff]  ;;  %v1574_v5 = vld [vmem:[#allocation10 + $0xe8] sm:$0xff] }
 0x658   : > { %2307 = vmatpush1.bf16.msra.mxu1 %v2306_v61 }
 0x659   : > { %2309 = vmatprep.subr.bf16.mxu1 %v2308_v13 }
 0x65c   : > { %2311 = vmatpush1.bf16.msra.mxu1 %v2310_v6 }
 0x65d   : > { %2313 = vmatprep.subr.bf16.mxu1 %v2312_v11  ;;  %v1526_v11 = vrot.slane %v1872_v19, %v3025_v60  ;;  %v1545_v60 = vld [vmem:[#allocation10] sm:$0xff] }
 0x65e   : > { %v2346_v20 = vpack.c.bf16 %v1547_v15, %v1545_v60  ;;  %v1586_v60 = vld [vmem:[#allocation10 + $0x148] sm:$0xff] }
 0x660   : > { %2315 = vmatpush1.bf16.msra.mxu1 %v2314_v0 }
 0x661   : > { %2317 = vmatprep.subr.bf16.mxu1 %v2316_v25 }
 0x664   : > { %2319 = vmatpush1.bf16.msra.mxu1 %v2318_v24  ;;  %v2348_v24 = vpack.c.bf16 %v1552_v21, %v1550_v17  ;;  %v1585_v21 = vld [vmem:[#allocation10 + $0x140] sm:$0xff] }
 0x665   : > { %2321 = vmatprep.subr.bf16.mxu1 %v2320_v3  ;;  %v1549_v3 = vld [vmem:[#allocation10 + $0x20] sm:$0xff] }
 0x666   : > { %v2350_v35 = vpack.c.bf16 %v1551_v29, %v1549_v3  ;;  %v1592_v3 = vld [vmem:[#allocation10 + $0x178] sm:$0xff] }
 0x668   : > { %2323 = vmatpush1.bf16.msra.mxu1 %v2322_v32  ;;  %v2352_v32 = vpack.c.bf16 %v1556_v30, %v1554_v4  ;;  %v1589_v30 = vld [vmem:[#allocation10 + $0x160] sm:$0xff] }
 0x669   : > { %2325 = vmatprep.subr.bf16.mxu1 %v2324_v38  ;;  %v1553_v38 = vld [vmem:[#allocation10 + $0x40] sm:$0xff] }
 0x66a   : > { %v2354_v50 = vpack.c.bf16 %v1555_v33, %v1553_v38  ;;  %v1596_v38 = vld [vmem:[#allocation10 + $0x198] sm:$0xff] }
 0x66c   : > { %2327 = vmatpush1.bf16.msra.mxu1 %v2326_v46  ;;  %v2356_v46 = vpack.c.bf16 %v1560_v44, %v1558_v34  ;;  %v1593_v44 = vld [vmem:[#allocation10 + $0x180] sm:$0xff] }
 0x66d   : > { %2329 = vmatprep.subr.bf16.mxu1 %v2328_v52  ;;  %v1557_v52 = vld [vmem:[#allocation10 + $0x60] sm:$0xff] }
 0x66e   : > { %v2358_v2 = vpack.c.bf16 %v1559_v23, %v1557_v52  ;;  %v1600_v52 = vld [vmem:[#allocation10 + $0x1b8] sm:$0xff] }
 0x670   : > { %2331 = vmatpush1.bf16.msra.mxu1 %v2330_v51  ;;  %v2360_v51 = vpack.c.bf16 %v1564_v31, %v1562_v48  ;;  %v1597_v31 = vld [vmem:[#allocation10 + $0x1a0] sm:$0xff] }
 0x671   : > { %2333 = vmatprep.subr.bf16.mxu1 %v2332_v7  ;;  %v1561_v7 = vld [vmem:[#allocation10 + $0x80] sm:$0xff] }
 0x672   : > { %v2362_v22 = vpack.c.bf16 %v1563_v53, %v1561_v7  ;;  %v1604_v7 = vld [vmem:[#allocation10 + $0x1d8] sm:$0xff] }
 0x674   : > { %2335 = vmatpush1.bf16.msra.mxu1 %v2334_v18  ;;  %v2364_v18 = vpack.c.bf16 %v1568_v36, %v1566_v55  ;;  %v1601_v36 = vld [vmem:[#allocation10 + $0x1c0] sm:$0xff] }
 0x675   : > { %2337 = vmatprep.subr.bf16.mxu1 %v2336_v26  ;;  %v1565_v26 = vld [vmem:[#allocation10 + $0xa0] sm:$0xff] }
 0x676   : > { %v2366_v40 = vpack.c.bf16 %v1567_v41, %v1565_v26  ;;  %v1608_v26 = vld [vmem:[#allocation10 + $0x1f8] sm:$0xff] }
 0x678   : > { %2339 = vmatpush1.bf16.msra.mxu1 %v2338_v58  ;;  %v1572_v58 = vld [vmem:[#allocation10 + $0xd8] sm:$0xff] }
 0x679   : > { %2341 = vmatprep.subr.bf16.mxu1 %v2340_v43  ;;  %v2368_v63 = vpack.c.bf16 %v1572_v58, %v1570_v56  ;;  %v1569_v43 = vld [vmem:[#allocation10 + $0xc0] sm:$0xff] }
 0x67a   : > { %v1605_v58 = vld [vmem:[#allocation10 + $0x1e0] sm:$0xff] }
 0x67c   : > { %2343 = vmatpush1.bf16.msra.mxu1 %v2342_v54  ;;  %v1576_v54 = vld [vmem:[#allocation10 + $0xf8] sm:$0xff] }
 0x712   : > { %v1233_v57 = vpop.f32.mrb[4].mxu1  ;;  %v1371_v12 = vpop.f32.mrb[6].mxu0 }
 0x713   : > { %1238 = vst [vmem:[%s3206_s20 + $0x10] sm:$0xff] %v1233_v57  ;;  %v1235_v61 = vpop.f32.mrb[5].mxu1  ;;  %v1373_v13 = vpop.f32.mrb[7].mxu0  ;;  %v1376_v16 = vsub.f32 %v3214_v39, %v1371_v12  ;;  %v1548_v39 = vld [vmem:[#allocation10 + $0x18] sm:$0xff]  ;;  %v2370_v57 = vpack.c.bf16 %v1571_v49, %v1569_v43  ;;  %v2372_v12 = vpack.c.bf16 %v1576_v54, %v1574_v5  ;;  %v1683_v5 = vsel %vm1682_vm8, %v3164_v1, %v3239_v27 }
 0x714   : > { %1239 = vst [vmem:[%s3206_s20 + $0x18] sm:$0xff] %v1235_v61  ;;  %v1377_v9 = vsub.f32 %v3211_v28, %v1373_v13  ;;  %v2344_v25 = vpack.c.bf16 %v1548_v39, %v1546_v62  ;;  %v1573_v61 = vld [vmem:[#allocation10 + $0xe0] sm:$0xff]  ;;  %v1575_v13 = vld [vmem:[#allocation10 + $0xf0] sm:$0xff] }
 0x715   : > { %v2374_v19 = vpack.c.bf16 %v1575_v13, %v1573_v61  ;;  %v1581_v62 = vld [vmem:[#allocation10 + $0x120] sm:$0xff]  ;;  %v1583_v39 = vld [vmem:[#allocation10 + $0x130] sm:$0xff] }
 0x716   : > { %1507 = vmatprep.mubr.f32.mxu1 %v1377_v9  ;;  %2345 = vmatprep.subr.bf16.mxu0 %v2344_v25  ;;  %v1578_v9 = vld [vmem:[#allocation10 + $0x108] sm:$0xff]  ;;  %v1588_v25 = vld [vmem:[#allocation10 + $0x158] sm:$0xff]  ;;  %v2382_v15 = vpack.c.bf16 %v1583_v39, %v1581_v62 }
 0x717   : > { %1508 = vmatmul.mubr.f32.vlgmr.msra.gmra.mrb[6].mxu1 %v1376_v16  ;;  %2347 = vmatpush1.bf16.msra.mxu0 %v2346_v20  ;;  %v1580_v16 = vld [vmem:[#allocation10 + $0x118] sm:$0xff]  ;;  %v2384_v17 = vpack.c.bf16 %v1588_v25, %v1586_v60  ;;  %v1587_v20 = vld [vmem:[#allocation10 + $0x150] sm:$0xff] }
 0x718   : > { %2349 = vmatprep.subr.bf16.mxu0 %v2348_v24  ;;  %v1590_v24 = vld [vmem:[#allocation10 + $0x168] sm:$0xff]  ;;  %v2386_v29 = vpack.c.bf16 %v1587_v20, %v1585_v21 }
 0x719   : > { %v2388_v4 = vpack.c.bf16 %v1592_v3, %v1590_v24 }
 0x71b   : > { %2351 = vmatpush1.bf16.msra.mxu0 %v2350_v35  ;;  %v1591_v35 = vld [vmem:[#allocation10 + $0x170] sm:$0xff] }
 0x71c   : > { %2353 = vmatprep.subr.bf16.mxu0 %v2352_v32  ;;  %v1594_v32 = vld [vmem:[#allocation10 + $0x188] sm:$0xff]  ;;  %v2390_v33 = vpack.c.bf16 %v1591_v35, %v1589_v30 }
 0x71d   : > { %v2392_v34 = vpack.c.bf16 %v1596_v38, %v1594_v32 }
 0x71f   : > { %2355 = vmatpush1.bf16.msra.mxu0 %v2354_v50  ;;  %v1595_v50 = vld [vmem:[#allocation10 + $0x190] sm:$0xff] }
 0x720   : > { %2357 = vmatprep.subr.bf16.mxu0 %v2356_v46  ;;  %v1598_v46 = vld [vmem:[#allocation10 + $0x1a8] sm:$0xff]  ;;  %v2394_v23 = vpack.c.bf16 %v1595_v50, %v1593_v44 }
 0x721   : > { %v2396_v48 = vpack.c.bf16 %v1600_v52, %v1598_v46 }
 0x723   : > { %2359 = vmatpush1.bf16.msra.mxu0 %v2358_v2  ;;  %v1599_v2 = vld [vmem:[#allocation10 + $0x1b0] sm:$0xff] }
 0x724   : > { %2361 = vmatprep.subr.bf16.mxu0 %v2360_v51  ;;  %v1602_v51 = vld [vmem:[#allocation10 + $0x1c8] sm:$0xff]  ;;  %v2398_v53 = vpack.c.bf16 %v1599_v2, %v1597_v31 }
 0x725   : > { %v2400_v55 = vpack.c.bf16 %v1604_v7, %v1602_v51 }
 0x727   : > { %2363 = vmatpush1.bf16.msra.mxu0 %v2362_v22  ;;  %v1603_v22 = vld [vmem:[#allocation10 + $0x1d0] sm:$0xff] }
 0x728   : > { %2365 = vmatprep.subr.bf16.mxu0 %v2364_v18  ;;  %v1606_v18 = vld [vmem:[#allocation10 + $0x1e8] sm:$0xff]  ;;  %v2402_v41 = vpack.c.bf16 %v1603_v22, %v1601_v36 }
 0x729   : > { %v2404_v56 = vpack.c.bf16 %v1608_v26, %v1606_v18 }
 0x72b   : > { %2367 = vmatpush1.bf16.msra.mxu0 %v2366_v40  ;;  %v1607_v40 = vld [vmem:[#allocation10 + $0x1f0] sm:$0xff] }
 0x72c   : > { %2369 = vmatprep.subr.bf16.mxu0 %v2368_v63  ;;  %v2406_v63 = vpack.c.bf16 %v1607_v40, %v1605_v58 }
 0x72f   : > { %2371 = vmatpush1.bf16.msra.mxu0 %v2370_v57 }
 0x730   : > { %2373 = vmatprep.subr.bf16.mxu0 %v2372_v12 }
 0x733   : > { %2375 = vmatpush1.bf16.msra.mxu0 %v2374_v19 }
 0x7ea   : > { %v1509_v6 = vpop.f32.mrb[6].mxu1 }
 0x7eb   : > { %v1516_v42 = vmul.f32 2.0, %v1509_v6  ;;  %v1511_v8 = vpop.f32.mrb[7].mxu1  ;;  %v1577_v6 = vld [vmem:[#allocation10 + $0x100] sm:$0xff] }
 0x7ec   : > { %v1517_v59 = vmul.f32 2.0, %v1511_v8  ;;  %v1584_v8 = vld [vmem:[#allocation10 + $0x138] sm:$0xff] }
 0x7ed   : > { %v3258_v14 = vsub.f32 %v1522_v37, %v1516_v42  ;;  %v2376_v37 = vpack.c.bf16 %v1580_v16, %v1578_v9  ;;  %v1582_v42 = vld [vmem:[#allocation10 + $0x128] sm:$0xff] }
 0x7ee   : > { %v3260_v0 = vsub.f32 %v1526_v11, %v1517_v59  ;;  %v1579_v11 = vld [vmem:[#allocation10 + $0x110] sm:$0xff] }
 0x7ef   : > { %v2378_v59 = vpack.c.bf16 %v1579_v11, %v1577_v6  ;;  %2377 = vmatprep.subr.bf16.mxu0 %v2376_v37 }
 0x7f0   : > { %vm1531_vm7 = vcmp.le.f32.partialorder %v3258_v14, %v3260_v0 }
 0x7f1   : > { %v1532_v28 = vsel %vm1531_vm7, %v3258_v14, %v3260_v0  ;;  %2379 = vmatpush1.bf16.msra.mxu0 %v2378_v59  ;;  %v1533_v49 = vsel %vm1531_vm7, %v3154_v45, %v3157_v47 }
 0x7f2   : > { %1534 = vmin.index.xlane.f32.xlu1 %v1532_v28  ;;  %v2380_v28 = vpack.c.bf16 %v1584_v8, %v1582_v42 }
 0x7f4   : > { %2381 = vmatprep.subr.bf16.mxu0 %v2380_v28 }
 0x7f5   : > { %2383 = vmatpush1.bf16.msra.mxu0 %v2382_v15 }
 0x7f6   : > { %2385 = vmatprep.subr.bf16.mxu0 %v2384_v17 }
 0x7f9   : > { %2387 = vmatpush1.bf16.msra.mxu0 %v2386_v29 }
 0x7fa   : > { %2389 = vmatprep.subr.bf16.mxu0 %v2388_v4 }
 0x7fd   : > { %2391 = vmatpush1.bf16.msra.mxu0 %v2390_v33 }
 0x7fe   : > { %2393 = vmatprep.subr.bf16.mxu0 %v2392_v34 }
 0x801   : > { %2395 = vmatpush1.bf16.msra.mxu0 %v2394_v23 }
 0x802   : > { %2397 = vmatprep.subr.bf16.mxu0 %v2396_v48 }
 0x805   : > { %2399 = vmatpush1.bf16.msra.mxu0 %v2398_v53 }
 0x806   : > { %2401 = vmatprep.subr.bf16.mxu0 %v2400_v55 }
 0x809   : > { %2403 = vmatpush1.bf16.msra.mxu0 %v2402_v41 }
 0x80a   : > { %2405 = vmatprep.subr.bf16.mxu0 %v2404_v56 }
 0x80d   : > { %2407 = vmatpush1.bf16.msra.mxu0 %v2406_v63 }
 0x87f   : > { %v1535_v43 = vpop.xlane.xlu1 %1534 }
 0x880   : > { %2503 = vset.pattern.permute.xlu0 %v1535_v43 }
 0x884   : > { %1537 = vperm.xlu0 %2503, %v1533_v49  }
 0x903   : > { %v1538_v14 = vpop.permute.xlu0 %1537 }
 0x904   : > { %vm1539_vm11 = vcmp.eq.s32.totalorder %v3154_v45, %v1538_v14  ;;  %vm1540_vm12 = vcmp.eq.s32.totalorder %v3157_v47, %v1538_v14  ;;  %v1685_v0 = vsel %vm1684_vm9, %v1683_v5, %v1538_v14 }
 0x905   : > { %1687 = vst.msk [vmem:[%s389_s9] sm:$0xff] %vm1686_vm10, %v1685_v0  ;;  %1875 = vmatprep.mubr.msk.f32.mxu0 %vm1540_vm12, %v2730_v10 }
 0x906   : > { %1876 = vmatmul.mubr.msk.f32.vlgmr.msra.gmra.mrb[8].mxu0 %vm1539_vm11, %v2730_v10 }
 0x9d9   : > { %v1675_v54 = vpop.f32.mrb[8].mxu0 }
 0x9da   : > { %1680 = vst [vmem:[%s3206_s20 + $0x20] sm:$0xff] %v1675_v54  ;;  %v1677_v45 = vpop.f32.mrb[9].mxu0 }
 0x9db   : > { %1681 = vst [vmem:[%s3206_s20 + $0x28] sm:$0xff] %v1677_v45 }
 0x9dc   : > { %2659 = shalt.err (!%p2656_p2)
}
 0x9dd   : > { %s2660_s1 = scalar_lea.hbm %s3290_s16, 768  ;;  %s2664_s12 = scalar_lea.hbm %s3344_s8, 1536 }
 0x9de   : > { %p2661_p8 = scmp.ne.s32.totalorder %s3290_s16, %s2660_s1  ;;  %p2665_p11 = scmp.lt.u32.totalorder %s3290_s16, %s3344_s8 }
 0x9df   : > { %p2666_p1 = scmp.lt.u32.totalorder %s2664_s12, %s2660_s1  ;;  %p2668_p5 = scmp.lt.u32.totalorder %s2660_s1, %s3290_s16 }
 0x9e0   : > { %p2662_p4 = pnand %p2661_p8, %p3364_p7 }
 0x9e1   : > { %p2667_p6 = por %p2666_p1, %p2665_p11 }
 0x9e2   : > { %p2663_p10 = pneg %p2662_p4 }
 0x9e3   : > { %p2669_p9 = por %p2668_p5, %p2667_p6 }
 0x9e5   : > { %p2670_p12 = pnand %p2669_p9, %p2663_p10 }
 0x9e7   : > { %2673 = shalt.err (!%p2670_p12)
}
 0x9e8   : > { %2428 = dma.vmem_to_hbm [thread:$0]  (%p3364_p7), %s3292_s15, 768, %s3290_s16, %s1693_s25  }
 0x9e9 PF: > { %s1729_s18 = sand.u32 1, %s2708_s27   ;;  %p3365_p3 = scmp.ne.s32.totalorder %s3357_s24, 0 }
 0x9ea   : > { %p3366_p13 = scmp.ge.s32.totalorder %s2720_s30, 2  ;;  %s1730_s13 = scalar_lea.sflag [#allocation4], %s1729_s18 }
 0x9ec   : > { %p2448_p0 = pnand %p3366_p13, %p3365_p3 }
 0x9ee   : > { %2703 = dma.done.wait (!%p2448_p0), %s1730_s13, 768  }
 0x9ef   : > { %2705 = vsyncadd (!%p2448_p0), %s1730_s13, 4294966528  ;;  %p24_p2 = scmp.ge.s32.totalorder %s2929_s23, 4   ;;  %s3367_s27 = smov %s2712_s28 }
 0x9f0   : > { %s3368_s28 = smov %s2716_s29  ;;  %s3369_s29 = smov %s2940_s21 }
 0x9f1   : > { %s3370_s30 = smov %s2929_s23  ;;  %26 = sbr.rel (!%p24_p2) target bundleno = 9 (0x9), region = 126 }
 0x9f8   :  { %1735 = vsyncpa [#allocation3], 1 }
 0x9f9   :  { %1737 = vsyncpa [#allocation3 + $0x1], 1 }
 0x9fa   :  { %1738 = vsyncpa [#allocation6], 1 }
 0x9fb   :  { %1739 = vsyncpa [#allocation9], 1 }
 0x9fc   :  { %1740 = vsyncpa [#allocation4], 1 }
 0x9fd   :  { %1742 = vsyncpa [#allocation4 + $0x1], 1 }

</bundles_post_ra>
